<compile_context>
chip_gen: v5e
topology: v5e:2x2
jax: 0.10.0
libtpu: 0.0.40
codegen_flags: <defaults>
</compile_context>

<pallas_src>
import math
from functools import partial

import jax
import jax.numpy as jnp
from jax import lax
from jax.experimental import pallas as pl
from jax.experimental.pallas import tpu as pltpu


def _shared_spec(shape):
    """Full-array block, same block for every grid step (shared weights)."""
    nd = len(shape)
    return pl.BlockSpec(shape, lambda b, _nd=nd: (0,) * _nd)


def _batched_spec(shape_wo_batch):
    """Per-graph-batch block: leading batch dim squeezed out of the kernel Ref."""
    nd = len(shape_wo_batch)
    return pl.BlockSpec((None,) + tuple(shape_wo_batch),
                        lambda b, _nd=nd: (b,) + (0,) * _nd)


# ---------------------------------------------------------------------------
# One fused kernel per graph-batch:
#   L x (TransformerConv + BN(train) + ReLU) -> global_mean_pool -> Linear
# ---------------------------------------------------------------------------
def gtn_fused_kernel(x_ref, adj_ref, pool_ref, w_ref, b_ref, gamma_ref,
                     beta_ref, lw_ref, lb_ref, o_ref, *, num_layers, hidden):
    H = hidden
    x = x_ref[...]                                   # [N, H] bf16 resident state
    adj = adj_ref[...]                               # [N, N] f32, adj[i,j]=1 iff edge j->i

    # Additive attention mask, computed once per batch: 0 on edges, -1e30 off.
    mask_bias = (1.0 - adj) * jnp.float32(-1e30)

    # Contract the last dim of both operands (q·kᵀ without an explicit k.T).
    qk_dims = (((1,), (1,)), ((), ()))

    for l in range(num_layers):                      # static unroll (L small)
        # Single lane-dense (4H = 128) projection, bf16 x bf16 -> f32 accumulate.
        # NOTE: Wq / bq already carry the 1/sqrt(H) softmax scale (folded at init).
        fused = jnp.dot(x, w_ref[l], preferred_element_type=jnp.float32) + b_ref[l]
        # 32-lane static slices of the 128-lane result (relayout cost is noise
        # at this size; verified acceptable — see review note).
        q = fused[:, 0:H].astype(jnp.bfloat16)
        k = fused[:, H:2 * H].astype(jnp.bfloat16)
        v = fused[:, 2 * H:3 * H].astype(jnp.bfloat16)
        skip = fused[:, 3 * H:4 * H]                 # f32

        # Masked softmax over source nodes j for each destination i.
        s = lax.dot_general(q, k, qk_dims,
                            preferred_element_type=jnp.float32) + mask_bias
        m = jnp.max(s, axis=-1, keepdims=True)
        e = jnp.exp(s - m) * adj                     # exact zero off-edge / isolated rows
        denom = jnp.sum(e, axis=-1, keepdims=True)
        p = e * pl.reciprocal(jnp.maximum(denom, 1e-30), approx=True)   # EUP

        h = jnp.dot(p.astype(jnp.bfloat16), v,
                    preferred_element_type=jnp.float32) + skip

        # BatchNorm1d, training mode (biased batch stats), centered variance, f32.
        mean = jnp.mean(h, axis=0, keepdims=True)
        c = h - mean
        var = jnp.mean(c * c, axis=0, keepdims=True)
        y = gamma_ref[l] * (c * lax.rsqrt(var + 1e-5)) + beta_ref[l]
        x = jnp.maximum(y, 0.0).astype(jnp.bfloat16)  # ReLU; one cast, stays in VMEM

    # global_mean_pool (precomputed [G, N] averaging matrix) + classifier head.
    pooled = jnp.dot(pool_ref[...], x.astype(jnp.float32),
                     preferred_element_type=jnp.float32)                 # [G, H]
    o_ref[...] = jnp.dot(pooled, lw_ref[...],
                         preferred_element_type=jnp.float32) + lb_ref[...]


def gtn_forward(x_pad, adj, pool_mat, w_all, b_all, gamma_all, beta_all,
                lin_w, lin_b):
    B, N, H = x_pad.shape
    L = w_all.shape[0]
    G = pool_mat.shape[1]
    C = lin_w.shape[1]
    batched = (x_pad, adj, pool_mat)
    shared = (w_all, b_all, gamma_all, beta_all, lin_w, lin_b)
    kernel = partial(gtn_fused_kernel, num_layers=L, hidden=H)
    return pl.pallas_call(
        kernel,
        out_shape=jax.ShapeDtypeStruct((B, G, C), jnp.float32),
        grid=(B,),
        in_specs=([_batched_spec(a.shape[1:]) for a in batched]
                  + [_shared_spec(a.shape) for a in shared]),
        out_specs=_batched_spec((G, C)),
        compiler_params=pltpu.CompilerParams(
            dimension_semantics=("parallel",),
            vmem_limit_bytes=32 * 1024 * 1024),
    )(*batched, *shared)


# ---------------------------------------------------------------------------
# Parameter init (deterministic, synthetic — shapes follow GTN.__init__)
# ---------------------------------------------------------------------------
def init_linear(key, fan_in, fan_out):
    k1, k2 = jax.random.split(key)
    w = jax.random.normal(k1, (fan_in, fan_out), jnp.float32) / jnp.sqrt(float(fan_in))
    b = 0.01 * jax.random.normal(k2, (1, fan_out), jnp.float32)
    return w, b


def init_layer_fused(key, fin, hidden):
    """Fused Wq|Wk|Wv|Wskip -> [H, 4H]; biases -> [1, 4H]; zero-pad fin -> H.
    The 1/sqrt(H) attention scale is folded into Wq / bq."""
    ks = jax.random.split(key, 4)
    scale = 1.0 / math.sqrt(float(hidden))
    ws, bs = [], []
    for i in range(4):                              # q, k, v, skip
        w, b = init_linear(ks[i], fin, hidden)
        if i == 0:                                  # fold softmax scale into q-proj
            w = w * scale
            b = b * scale
        if fin < hidden:
            w = jnp.pad(w, ((0, hidden - fin), (0, 0)))
        ws.append(w)
        bs.append(b)
    w_fused = jnp.concatenate(ws, axis=1)           # [H, 4H]
    b_fused = jnp.concatenate(bs, axis=1)           # [1, 4H]
    gamma = jnp.ones((1, hidden), jnp.float32)
    beta = jnp.zeros((1, hidden), jnp.float32)
    return w_fused, b_fused, gamma, beta


if __name__ == "__main__":
    key = jax.random.PRNGKey(0)

    # Small, module-consistent sizes:
    B = 2                   # graph-batches per launch (grid axis, "parallel")
    N = 16                  # nodes per graph-batch
    num_node_features = 12
    hidden_channels = 32
    num_classes = 3
    num_layers = 1          # extra conv layers in GTN.__init__ loop
    G = 2                   # graphs per graph-batch
    L = 3 + num_layers      # conv1, conv2, conv3, + extras

    k_x, k_p = jax.random.split(key)
    x = jax.random.normal(k_x, (B, N, num_node_features), jnp.float32)
    # Zero-pad features to H so every layer shares the fused [H, 4H] projection;
    # resident hidden state is bf16.
    x_pad = jnp.pad(x, ((0, 0), (0, 0), (0, hidden_channels - num_node_features)))
    x_pad = x_pad.astype(jnp.bfloat16)

    # edge_index: a directed ring in both directions (every node has neighbors),
    # identical structure replicated per graph-batch.
    src = jnp.concatenate([jnp.arange(N), (jnp.arange(N) + 1) % N])
    dst = jnp.concatenate([(jnp.arange(N) + 1) % N, jnp.arange(N)])
    adj1 = jnp.zeros((N, N), jnp.float32).at[dst, src].set(1.0)   # adj[i,j]=1 iff edge j->i
    adj = jnp.tile(adj1[None], (B, 1, 1))

    # batch assignment vector -> mean-pooling matrix [G, N]
    batch = jnp.concatenate([jnp.zeros(N // 2, jnp.int32),
                             jnp.ones(N - N // 2, jnp.int32)])
    pool1 = (batch[None, :] == jnp.arange(G, dtype=jnp.int32)[:, None]).astype(jnp.float32)
    pool1 = pool1 / jnp.maximum(pool1.sum(axis=1, keepdims=True), 1.0)
    pool = jnp.tile(pool1[None], (B, 1, 1))

    # Per-layer fused parameters, stacked along a leading layer axis.
    keys = jax.random.split(k_p, L + 1)
    fused = [init_layer_fused(keys[0], num_node_features, hidden_channels)]
    fused += [init_layer_fused(keys[1 + i], hidden_channels, hidden_channels)
              for i in range(L - 1)]
    w_all = jnp.stack([f[0] for f in fused]).astype(jnp.bfloat16)  # [L, H, 4H] bf16 MXU operands
    b_all = jnp.stack([f[1] for f in fused])                       # [L, 1, 4H] f32
    gamma_all = jnp.stack([f[2] for f in fused])                   # [L, 1, H]
    beta_all = jnp.stack([f[3] for f in fused])                    # [L, 1, H]
    lin_w, lin_b = init_linear(keys[-1], hidden_channels, num_classes)

    out = gtn_forward(x_pad, adj, pool, w_all, b_all, gamma_all, beta_all,
                      lin_w, lin_b)
    out = jax.block_until_ready(out)
    assert out.shape == (B, G, num_classes)
    assert bool(jnp.all(jnp.isfinite(out)))
    print("KERNEL_OK")
</pallas_src>

<mosaic_0001>
module attributes {stable_mosaic.version = 11 : i64} {
  func.func @gtn_fused_kernel(%arg0: i32, %arg1: memref<1x16x32xbf16, #tpu.memory_space<vmem>>, %arg2: memref<1x16x16xf32, #tpu.memory_space<vmem>>, %arg3: memref<1x2x16xf32, #tpu.memory_space<vmem>>, %arg4: memref<4x32x128xbf16, #tpu.memory_space<vmem>>, %arg5: memref<4x1x128xf32, #tpu.memory_space<vmem>>, %arg6: memref<4x1x32xf32, #tpu.memory_space<vmem>>, %arg7: memref<4x1x32xf32, #tpu.memory_space<vmem>>, %arg8: memref<32x3xf32, #tpu.memory_space<vmem>>, %arg9: memref<1x3xf32, #tpu.memory_space<vmem>>, %arg10: memref<1x2x3xf32, #tpu.memory_space<vmem>>) attributes {dimension_semantics = [#tpu.dimension_semantics<parallel>], iteration_bounds = array<i64: 2>, scalar_prefetch = 0 : i64, scratch_operands = 0 : i64, tpu.core_type = #tpu.core_type<tc>, window_params = [{transform_indices = @transform_0, window_bounds = array<i64: 1, 16, 32>}, {transform_indices = @transform_1, window_bounds = array<i64: 1, 16, 16>}, {transform_indices = @transform_2, window_bounds = array<i64: 1, 2, 16>}, {pipeline_mode = #tpu.pipeline_mode<synchronous>, transform_indices = @transform_3, window_bounds = array<i64: 4, 32, 128>}, {pipeline_mode = #tpu.pipeline_mode<synchronous>, transform_indices = @transform_4, window_bounds = array<i64: 4, 1, 128>}, {pipeline_mode = #tpu.pipeline_mode<synchronous>, transform_indices = @transform_5, window_bounds = array<i64: 4, 1, 32>}, {pipeline_mode = #tpu.pipeline_mode<synchronous>, transform_indices = @transform_6, window_bounds = array<i64: 4, 1, 32>}, {pipeline_mode = #tpu.pipeline_mode<synchronous>, transform_indices = @transform_7, window_bounds = array<i64: 32, 3>}, {pipeline_mode = #tpu.pipeline_mode<synchronous>, transform_indices = @transform_8, window_bounds = array<i64: 1, 3>}, {transform_indices = @transform_9, window_bounds = array<i64: 1, 2, 3>}]} {
    %c0 = arith.constant 0 : index
    %c0_0 = arith.constant 0 : index
    %c0_1 = arith.constant 0 : index
    %0 = vector.load %arg1[%c0, %c0_0, %c0_1] : memref<1x16x32xbf16, #tpu.memory_space<vmem>>, vector<1x16x32xbf16>
    %1 = vector.shape_cast %0 : vector<1x16x32xbf16> to vector<16x32xbf16>
    %c0_2 = arith.constant 0 : index
    %c0_3 = arith.constant 0 : index
    %c0_4 = arith.constant 0 : index
    %2 = vector.load %arg2[%c0_2, %c0_3, %c0_4] : memref<1x16x16xf32, #tpu.memory_space<vmem>>, vector<1x16x16xf32>
    %3 = vector.shape_cast %2 : vector<1x16x16xf32> to vector<16x16xf32>
    %cst = arith.constant 1.000000e+00 : f32
    %4 = vector.broadcast %cst : f32 to vector<16x16xf32>
    %5 = arith.subf %4, %3 : vector<16x16xf32>
    %cst_5 = arith.constant -1.000000e+30 : f32
    %6 = vector.broadcast %cst_5 : f32 to vector<16x16xf32>
    %7 = arith.mulf %5, %6 : vector<16x16xf32>
    %c0_6 = arith.constant 0 : index
    %c0_7 = arith.constant 0 : index
    %c0_8 = arith.constant 0 : index
    %8 = vector.load %arg4[%c0_6, %c0_7, %c0_8] : memref<4x32x128xbf16, #tpu.memory_space<vmem>>, vector<1x32x128xbf16>
    %9 = vector.shape_cast %8 : vector<1x32x128xbf16> to vector<32x128xbf16>
    %cst_9 = arith.constant dense<0.000000e+00> : vector<16x128xf32>
    %10 = tpu.matmul %1, %9, %cst_9 {dimension_numbers = #tpu.dot_dimension_numbers<[1], [0], [0], [1], [0, 0, 1, 1], [], []>} : vector<16x32xbf16>, vector<32x128xbf16>, vector<16x128xf32> -> vector<16x128xf32>
    %c0_10 = arith.constant 0 : index
    %c0_11 = arith.constant 0 : index
    %c0_12 = arith.constant 0 : index
    %11 = vector.load %arg5[%c0_10, %c0_11, %c0_12] : memref<4x1x128xf32, #tpu.memory_space<vmem>>, vector<1x1x128xf32>
    %12 = vector.shape_cast %11 : vector<1x1x128xf32> to vector<1x128xf32>
    %13 = vector.broadcast %12 : vector<1x128xf32> to vector<16x128xf32>
    %14 = arith.addf %10, %13 : vector<16x128xf32>
    %15 = vector.extract_strided_slice %14 {offsets = [0, 0], sizes = [16, 32], strides = [1, 1]} : vector<16x128xf32> to vector<16x32xf32>
    %16 = arith.truncf %15 : vector<16x32xf32> to vector<16x32xbf16>
    %17 = vector.extract_strided_slice %14 {offsets = [0, 32], sizes = [16, 32], strides = [1, 1]} : vector<16x128xf32> to vector<16x32xf32>
    %18 = arith.truncf %17 : vector<16x32xf32> to vector<16x32xbf16>
    %19 = vector.extract_strided_slice %14 {offsets = [0, 64], sizes = [16, 32], strides = [1, 1]} : vector<16x128xf32> to vector<16x32xf32>
    %20 = arith.truncf %19 : vector<16x32xf32> to vector<16x32xbf16>
    %21 = vector.extract_strided_slice %14 {offsets = [0, 96], sizes = [16, 32], strides = [1, 1]} : vector<16x128xf32> to vector<16x32xf32>
    %cst_13 = arith.constant dense<0.000000e+00> : vector<16x16xf32>
    %22 = tpu.matmul %16, %18, %cst_13 {dimension_numbers = #tpu.dot_dimension_numbers<[1], [1], [0], [0], [0, 0, 1, 0], [], []>} : vector<16x32xbf16>, vector<16x32xbf16>, vector<16x16xf32> -> vector<16x16xf32>
    %23 = arith.addf %22, %7 : vector<16x16xf32>
    %cst_14 = arith.constant dense<0xFF800000> : vector<16xf32>
    %24 = vector.multi_reduction <maximumf>, %23, %cst_14 [1] : vector<16x16xf32> to vector<16xf32>
    %25 = vector.shape_cast %24 : vector<16xf32> to vector<16x1xf32>
    %26 = vector.broadcast %25 : vector<16x1xf32> to vector<16x16xf32>
    %27 = arith.subf %23, %26 : vector<16x16xf32>
    %28 = math.exp %27 : vector<16x16xf32>
    %29 = arith.mulf %28, %3 : vector<16x16xf32>
    %cst_15 = arith.constant dense<0.000000e+00> : vector<16xf32>
    %30 = vector.multi_reduction <add>, %29, %cst_15 [1] : vector<16x16xf32> to vector<16xf32>
    %31 = vector.shape_cast %30 : vector<16xf32> to vector<16x1xf32>
    %cst_16 = arith.constant 1.000000e-30 : f32
    %32 = vector.broadcast %cst_16 : f32 to vector<16x1xf32>
    %33 = arith.maximumf %31, %32 : vector<16x1xf32>
    %34 = tpu.reciprocal %33 {approx = true} : vector<16x1xf32> -> vector<16x1xf32>
    %35 = vector.broadcast %34 : vector<16x1xf32> to vector<16x16xf32>
    %36 = arith.mulf %29, %35 : vector<16x16xf32>
    %37 = arith.truncf %36 : vector<16x16xf32> to vector<16x16xbf16>
    %cst_17 = arith.constant dense<0.000000e+00> : vector<16x32xf32>
    %38 = tpu.matmul %37, %20, %cst_17 {dimension_numbers = #tpu.dot_dimension_numbers<[1], [0], [0], [1], [0, 0, 1, 1], [], []>} : vector<16x16xbf16>, vector<16x32xbf16>, vector<16x32xf32> -> vector<16x32xf32>
    %39 = arith.addf %38, %21 : vector<16x32xf32>
    %cst_18 = arith.constant dense<0.000000e+00> : vector<32xf32>
    %40 = vector.multi_reduction <add>, %39, %cst_18 [0] : vector<16x32xf32> to vector<32xf32>
    %41 = vector.shape_cast %40 : vector<32xf32> to vector<1x32xf32>
    %cst_19 = arith.constant 1.600000e+01 : f32
    %42 = vector.broadcast %cst_19 : f32 to vector<1x32xf32>
    %43 = arith.divf %41, %42 : vector<1x32xf32>
    %44 = vector.broadcast %43 : vector<1x32xf32> to vector<16x32xf32>
    %45 = arith.subf %39, %44 : vector<16x32xf32>
    %46 = arith.mulf %45, %45 : vector<16x32xf32>
    %cst_20 = arith.constant dense<0.000000e+00> : vector<32xf32>
    %47 = vector.multi_reduction <add>, %46, %cst_20 [0] : vector<16x32xf32> to vector<32xf32>
    %48 = vector.shape_cast %47 : vector<32xf32> to vector<1x32xf32>
    %cst_21 = arith.constant 1.600000e+01 : f32
    %49 = vector.broadcast %cst_21 : f32 to vector<1x32xf32>
    %50 = arith.divf %48, %49 : vector<1x32xf32>
    %c0_22 = arith.constant 0 : index
    %c0_23 = arith.constant 0 : index
    %c0_24 = arith.constant 0 : index
    %51 = vector.load %arg6[%c0_22, %c0_23, %c0_24] : memref<4x1x32xf32, #tpu.memory_space<vmem>>, vector<1x1x32xf32>
    %52 = vector.shape_cast %51 : vector<1x1x32xf32> to vector<1x32xf32>
    %cst_25 = arith.constant 9.99999974E-6 : f32
    %53 = vector.broadcast %cst_25 : f32 to vector<1x32xf32>
    %54 = arith.addf %50, %53 : vector<1x32xf32>
    %55 = math.rsqrt %54 : vector<1x32xf32>
    %56 = vector.broadcast %55 : vector<1x32xf32> to vector<16x32xf32>
    %57 = arith.mulf %45, %56 : vector<16x32xf32>
    %58 = vector.broadcast %52 : vector<1x32xf32> to vector<16x32xf32>
    %59 = arith.mulf %58, %57 : vector<16x32xf32>
    %c0_26 = arith.constant 0 : index
    %c0_27 = arith.constant 0 : index
    %c0_28 = arith.constant 0 : index
    %60 = vector.load %arg7[%c0_26, %c0_27, %c0_28] : memref<4x1x32xf32, #tpu.memory_space<vmem>>, vector<1x1x32xf32>
    %61 = vector.shape_cast %60 : vector<1x1x32xf32> to vector<1x32xf32>
    %62 = vector.broadcast %61 : vector<1x32xf32> to vector<16x32xf32>
    %63 = arith.addf %59, %62 : vector<16x32xf32>
    %cst_29 = arith.constant 0.000000e+00 : f32
    %64 = vector.broadcast %cst_29 : f32 to vector<16x32xf32>
    %65 = arith.maximumf %63, %64 : vector<16x32xf32>
    %66 = arith.truncf %65 : vector<16x32xf32> to vector<16x32xbf16>
    %c1 = arith.constant 1 : index
    %c0_30 = arith.constant 0 : index
    %c0_31 = arith.constant 0 : index
    %67 = vector.load %arg4[%c1, %c0_30, %c0_31] : memref<4x32x128xbf16, #tpu.memory_space<vmem>>, vector<1x32x128xbf16>
    %68 = vector.shape_cast %67 : vector<1x32x128xbf16> to vector<32x128xbf16>
    %cst_32 = arith.constant dense<0.000000e+00> : vector<16x128xf32>
    %69 = tpu.matmul %66, %68, %cst_32 {dimension_numbers = #tpu.dot_dimension_numbers<[1], [0], [0], [1], [0, 0, 1, 1], [], []>} : vector<16x32xbf16>, vector<32x128xbf16>, vector<16x128xf32> -> vector<16x128xf32>
    %c1_33 = arith.constant 1 : index
    %c0_34 = arith.constant 0 : index
    %c0_35 = arith.constant 0 : index
    %70 = vector.load %arg5[%c1_33, %c0_34, %c0_35] : memref<4x1x128xf32, #tpu.memory_space<vmem>>, vector<1x1x128xf32>
    %71 = vector.shape_cast %70 : vector<1x1x128xf32> to vector<1x128xf32>
    %72 = vector.broadcast %71 : vector<1x128xf32> to vector<16x128xf32>
    %73 = arith.addf %69, %72 : vector<16x128xf32>
    %74 = vector.extract_strided_slice %73 {offsets = [0, 0], sizes = [16, 32], strides = [1, 1]} : vector<16x128xf32> to vector<16x32xf32>
    %75 = arith.truncf %74 : vector<16x32xf32> to vector<16x32xbf16>
    %76 = vector.extract_strided_slice %73 {offsets = [0, 32], sizes = [16, 32], strides = [1, 1]} : vector<16x128xf32> to vector<16x32xf32>
    %77 = arith.truncf %76 : vector<16x32xf32> to vector<16x32xbf16>
    %78 = vector.extract_strided_slice %73 {offsets = [0, 64], sizes = [16, 32], strides = [1, 1]} : vector<16x128xf32> to vector<16x32xf32>
    %79 = arith.truncf %78 : vector<16x32xf32> to vector<16x32xbf16>
    %80 = vector.extract_strided_slice %73 {offsets = [0, 96], sizes = [16, 32], strides = [1, 1]} : vector<16x128xf32> to vector<16x32xf32>
    %cst_36 = arith.constant dense<0.000000e+00> : vector<16x16xf32>
    %81 = tpu.matmul %75, %77, %cst_36 {dimension_numbers = #tpu.dot_dimension_numbers<[1], [1], [0], [0], [0, 0, 1, 0], [], []>} : vector<16x32xbf16>, vector<16x32xbf16>, vector<16x16xf32> -> vector<16x16xf32>
    %82 = arith.addf %81, %7 : vector<16x16xf32>
    %cst_37 = arith.constant dense<0xFF800000> : vector<16xf32>
    %83 = vector.multi_reduction <maximumf>, %82, %cst_37 [1] : vector<16x16xf32> to vector<16xf32>
    %84 = vector.shape_cast %83 : vector<16xf32> to vector<16x1xf32>
    %85 = vector.broadcast %84 : vector<16x1xf32> to vector<16x16xf32>
    %86 = arith.subf %82, %85 : vector<16x16xf32>
    %87 = math.exp %86 : vector<16x16xf32>
    %88 = arith.mulf %87, %3 : vector<16x16xf32>
    %cst_38 = arith.constant dense<0.000000e+00> : vector<16xf32>
    %89 = vector.multi_reduction <add>, %88, %cst_38 [1] : vector<16x16xf32> to vector<16xf32>
    %90 = vector.shape_cast %89 : vector<16xf32> to vector<16x1xf32>
    %cst_39 = arith.constant 1.000000e-30 : f32
    %91 = vector.broadcast %cst_39 : f32 to vector<16x1xf32>
    %92 = arith.maximumf %90, %91 : vector<16x1xf32>
    %93 = tpu.reciprocal %92 {approx = true} : vector<16x1xf32> -> vector<16x1xf32>
    %94 = vector.broadcast %93 : vector<16x1xf32> to vector<16x16xf32>
    %95 = arith.mulf %88, %94 : vector<16x16xf32>
    %96 = arith.truncf %95 : vector<16x16xf32> to vector<16x16xbf16>
    %cst_40 = arith.constant dense<0.000000e+00> : vector<16x32xf32>
    %97 = tpu.matmul %96, %79, %cst_40 {dimension_numbers = #tpu.dot_dimension_numbers<[1], [0], [0], [1], [0, 0, 1, 1], [], []>} : vector<16x16xbf16>, vector<16x32xbf16>, vector<16x32xf32> -> vector<16x32xf32>
    %98 = arith.addf %97, %80 : vector<16x32xf32>
    %cst_41 = arith.constant dense<0.000000e+00> : vector<32xf32>
    %99 = vector.multi_reduction <add>, %98, %cst_41 [0] : vector<16x32xf32> to vector<32xf32>
    %100 = vector.shape_cast %99 : vector<32xf32> to vector<1x32xf32>
    %cst_42 = arith.constant 1.600000e+01 : f32
    %101 = vector.broadcast %cst_42 : f32 to vector<1x32xf32>
    %102 = arith.divf %100, %101 : vector<1x32xf32>
    %103 = vector.broadcast %102 : vector<1x32xf32> to vector<16x32xf32>
    %104 = arith.subf %98, %103 : vector<16x32xf32>
    %105 = arith.mulf %104, %104 : vector<16x32xf32>
    %cst_43 = arith.constant dense<0.000000e+00> : vector<32xf32>
    %106 = vector.multi_reduction <add>, %105, %cst_43 [0] : vector<16x32xf32> to vector<32xf32>
    %107 = vector.shape_cast %106 : vector<32xf32> to vector<1x32xf32>
    %cst_44 = arith.constant 1.600000e+01 : f32
    %108 = vector.broadcast %cst_44 : f32 to vector<1x32xf32>
    %109 = arith.divf %107, %108 : vector<1x32xf32>
    %c1_45 = arith.constant 1 : index
    %c0_46 = arith.constant 0 : index
    %c0_47 = arith.constant 0 : index
    %110 = vector.load %arg6[%c1_45, %c0_46, %c0_47] : memref<4x1x32xf32, #tpu.memory_space<vmem>>, vector<1x1x32xf32>
    %111 = vector.shape_cast %110 : vector<1x1x32xf32> to vector<1x32xf32>
    %cst_48 = arith.constant 9.99999974E-6 : f32
    %112 = vector.broadcast %cst_48 : f32 to vector<1x32xf32>
    %113 = arith.addf %109, %112 : vector<1x32xf32>
    %114 = math.rsqrt %113 : vector<1x32xf32>
    %115 = vector.broadcast %114 : vector<1x32xf32> to vector<16x32xf32>
    %116 = arith.mulf %104, %115 : vector<16x32xf32>
    %117 = vector.broadcast %111 : vector<1x32xf32> to vector<16x32xf32>
    %118 = arith.mulf %117, %116 : vector<16x32xf32>
    %c1_49 = arith.constant 1 : index
    %c0_50 = arith.constant 0 : index
    %c0_51 = arith.constant 0 : index
    %119 = vector.load %arg7[%c1_49, %c0_50, %c0_51] : memref<4x1x32xf32, #tpu.memory_space<vmem>>, vector<1x1x32xf32>
    %120 = vector.shape_cast %119 : vector<1x1x32xf32> to vector<1x32xf32>
    %121 = vector.broadcast %120 : vector<1x32xf32> to vector<16x32xf32>
    %122 = arith.addf %118, %121 : vector<16x32xf32>
    %cst_52 = arith.constant 0.000000e+00 : f32
    %123 = vector.broadcast %cst_52 : f32 to vector<16x32xf32>
    %124 = arith.maximumf %122, %123 : vector<16x32xf32>
    %125 = arith.truncf %124 : vector<16x32xf32> to vector<16x32xbf16>
    %c2 = arith.constant 2 : index
    %c0_53 = arith.constant 0 : index
    %c0_54 = arith.constant 0 : index
    %126 = vector.load %arg4[%c2, %c0_53, %c0_54] : memref<4x32x128xbf16, #tpu.memory_space<vmem>>, vector<1x32x128xbf16>
    %127 = vector.shape_cast %126 : vector<1x32x128xbf16> to vector<32x128xbf16>
    %cst_55 = arith.constant dense<0.000000e+00> : vector<16x128xf32>
    %128 = tpu.matmul %125, %127, %cst_55 {dimension_numbers = #tpu.dot_dimension_numbers<[1], [0], [0], [1], [0, 0, 1, 1], [], []>} : vector<16x32xbf16>, vector<32x128xbf16>, vector<16x128xf32> -> vector<16x128xf32>
    %c2_56 = arith.constant 2 : index
    %c0_57 = arith.constant 0 : index
    %c0_58 = arith.constant 0 : index
    %129 = vector.load %arg5[%c2_56, %c0_57, %c0_58] : memref<4x1x128xf32, #tpu.memory_space<vmem>>, vector<1x1x128xf32>
    %130 = vector.shape_cast %129 : vector<1x1x128xf32> to vector<1x128xf32>
    %131 = vector.broadcast %130 : vector<1x128xf32> to vector<16x128xf32>
    %132 = arith.addf %128, %131 : vector<16x128xf32>
    %133 = vector.extract_strided_slice %132 {offsets = [0, 0], sizes = [16, 32], strides = [1, 1]} : vector<16x128xf32> to vector<16x32xf32>
    %134 = arith.truncf %133 : vector<16x32xf32> to vector<16x32xbf16>
    %135 = vector.extract_strided_slice %132 {offsets = [0, 32], sizes = [16, 32], strides = [1, 1]} : vector<16x128xf32> to vector<16x32xf32>
    %136 = arith.truncf %135 : vector<16x32xf32> to vector<16x32xbf16>
    %137 = vector.extract_strided_slice %132 {offsets = [0, 64], sizes = [16, 32], strides = [1, 1]} : vector<16x128xf32> to vector<16x32xf32>
    %138 = arith.truncf %137 : vector<16x32xf32> to vector<16x32xbf16>
    %139 = vector.extract_strided_slice %132 {offsets = [0, 96], sizes = [16, 32], strides = [1, 1]} : vector<16x128xf32> to vector<16x32xf32>
    %cst_59 = arith.constant dense<0.000000e+00> : vector<16x16xf32>
    %140 = tpu.matmul %134, %136, %cst_59 {dimension_numbers = #tpu.dot_dimension_numbers<[1], [1], [0], [0], [0, 0, 1, 0], [], []>} : vector<16x32xbf16>, vector<16x32xbf16>, vector<16x16xf32> -> vector<16x16xf32>
    %141 = arith.addf %140, %7 : vector<16x16xf32>
    %cst_60 = arith.constant dense<0xFF800000> : vector<16xf32>
    %142 = vector.multi_reduction <maximumf>, %141, %cst_60 [1] : vector<16x16xf32> to vector<16xf32>
    %143 = vector.shape_cast %142 : vector<16xf32> to vector<16x1xf32>
    %144 = vector.broadcast %143 : vector<16x1xf32> to vector<16x16xf32>
    %145 = arith.subf %141, %144 : vector<16x16xf32>
    %146 = math.exp %145 : vector<16x16xf32>
    %147 = arith.mulf %146, %3 : vector<16x16xf32>
    %cst_61 = arith.constant dense<0.000000e+00> : vector<16xf32>
    %148 = vector.multi_reduction <add>, %147, %cst_61 [1] : vector<16x16xf32> to vector<16xf32>
    %149 = vector.shape_cast %148 : vector<16xf32> to vector<16x1xf32>
    %cst_62 = arith.constant 1.000000e-30 : f32
    %150 = vector.broadcast %cst_62 : f32 to vector<16x1xf32>
    %151 = arith.maximumf %149, %150 : vector<16x1xf32>
    %152 = tpu.reciprocal %151 {approx = true} : vector<16x1xf32> -> vector<16x1xf32>
    %153 = vector.broadcast %152 : vector<16x1xf32> to vector<16x16xf32>
    %154 = arith.mulf %147, %153 : vector<16x16xf32>
    %155 = arith.truncf %154 : vector<16x16xf32> to vector<16x16xbf16>
    %cst_63 = arith.constant dense<0.000000e+00> : vector<16x32xf32>
    %156 = tpu.matmul %155, %138, %cst_63 {dimension_numbers = #tpu.dot_dimension_numbers<[1], [0], [0], [1], [0, 0, 1, 1], [], []>} : vector<16x16xbf16>, vector<16x32xbf16>, vector<16x32xf32> -> vector<16x32xf32>
    %157 = arith.addf %156, %139 : vector<16x32xf32>
    %cst_64 = arith.constant dense<0.000000e+00> : vector<32xf32>
    %158 = vector.multi_reduction <add>, %157, %cst_64 [0] : vector<16x32xf32> to vector<32xf32>
    %159 = vector.shape_cast %158 : vector<32xf32> to vector<1x32xf32>
    %cst_65 = arith.constant 1.600000e+01 : f32
    %160 = vector.broadcast %cst_65 : f32 to vector<1x32xf32>
    %161 = arith.divf %159, %160 : vector<1x32xf32>
    %162 = vector.broadcast %161 : vector<1x32xf32> to vector<16x32xf32>
    %163 = arith.subf %157, %162 : vector<16x32xf32>
    %164 = arith.mulf %163, %163 : vector<16x32xf32>
    %cst_66 = arith.constant dense<0.000000e+00> : vector<32xf32>
    %165 = vector.multi_reduction <add>, %164, %cst_66 [0] : vector<16x32xf32> to vector<32xf32>
    %166 = vector.shape_cast %165 : vector<32xf32> to vector<1x32xf32>
    %cst_67 = arith.constant 1.600000e+01 : f32
    %167 = vector.broadcast %cst_67 : f32 to vector<1x32xf32>
    %168 = arith.divf %166, %167 : vector<1x32xf32>
    %c2_68 = arith.constant 2 : index
    %c0_69 = arith.constant 0 : index
    %c0_70 = arith.constant 0 : index
    %169 = vector.load %arg6[%c2_68, %c0_69, %c0_70] : memref<4x1x32xf32, #tpu.memory_space<vmem>>, vector<1x1x32xf32>
    %170 = vector.shape_cast %169 : vector<1x1x32xf32> to vector<1x32xf32>
    %cst_71 = arith.constant 9.99999974E-6 : f32
    %171 = vector.broadcast %cst_71 : f32 to vector<1x32xf32>
    %172 = arith.addf %168, %171 : vector<1x32xf32>
    %173 = math.rsqrt %172 : vector<1x32xf32>
    %174 = vector.broadcast %173 : vector<1x32xf32> to vector<16x32xf32>
    %175 = arith.mulf %163, %174 : vector<16x32xf32>
    %176 = vector.broadcast %170 : vector<1x32xf32> to vector<16x32xf32>
    %177 = arith.mulf %176, %175 : vector<16x32xf32>
    %c2_72 = arith.constant 2 : index
    %c0_73 = arith.constant 0 : index
    %c0_74 = arith.constant 0 : index
    %178 = vector.load %arg7[%c2_72, %c0_73, %c0_74] : memref<4x1x32xf32, #tpu.memory_space<vmem>>, vector<1x1x32xf32>
    %179 = vector.shape_cast %178 : vector<1x1x32xf32> to vector<1x32xf32>
    %180 = vector.broadcast %179 : vector<1x32xf32> to vector<16x32xf32>
    %181 = arith.addf %177, %180 : vector<16x32xf32>
    %cst_75 = arith.constant 0.000000e+00 : f32
    %182 = vector.broadcast %cst_75 : f32 to vector<16x32xf32>
    %183 = arith.maximumf %181, %182 : vector<16x32xf32>
    %184 = arith.truncf %183 : vector<16x32xf32> to vector<16x32xbf16>
    %c3 = arith.constant 3 : index
    %c0_76 = arith.constant 0 : index
    %c0_77 = arith.constant 0 : index
    %185 = vector.load %arg4[%c3, %c0_76, %c0_77] : memref<4x32x128xbf16, #tpu.memory_space<vmem>>, vector<1x32x128xbf16>
    %186 = vector.shape_cast %185 : vector<1x32x128xbf16> to vector<32x128xbf16>
    %cst_78 = arith.constant dense<0.000000e+00> : vector<16x128xf32>
    %187 = tpu.matmul %184, %186, %cst_78 {dimension_numbers = #tpu.dot_dimension_numbers<[1], [0], [0], [1], [0, 0, 1, 1], [], []>} : vector<16x32xbf16>, vector<32x128xbf16>, vector<16x128xf32> -> vector<16x128xf32>
    %c3_79 = arith.constant 3 : index
    %c0_80 = arith.constant 0 : index
    %c0_81 = arith.constant 0 : index
    %188 = vector.load %arg5[%c3_79, %c0_80, %c0_81] : memref<4x1x128xf32, #tpu.memory_space<vmem>>, vector<1x1x128xf32>
    %189 = vector.shape_cast %188 : vector<1x1x128xf32> to vector<1x128xf32>
    %190 = vector.broadcast %189 : vector<1x128xf32> to vector<16x128xf32>
    %191 = arith.addf %187, %190 : vector<16x128xf32>
    %192 = vector.extract_strided_slice %191 {offsets = [0, 0], sizes = [16, 32], strides = [1, 1]} : vector<16x128xf32> to vector<16x32xf32>
    %193 = arith.truncf %192 : vector<16x32xf32> to vector<16x32xbf16>
    %194 = vector.extract_strided_slice %191 {offsets = [0, 32], sizes = [16, 32], strides = [1, 1]} : vector<16x128xf32> to vector<16x32xf32>
    %195 = arith.truncf %194 : vector<16x32xf32> to vector<16x32xbf16>
    %196 = vector.extract_strided_slice %191 {offsets = [0, 64], sizes = [16, 32], strides = [1, 1]} : vector<16x128xf32> to vector<16x32xf32>
    %197 = arith.truncf %196 : vector<16x32xf32> to vector<16x32xbf16>
    %198 = vector.extract_strided_slice %191 {offsets = [0, 96], sizes = [16, 32], strides = [1, 1]} : vector<16x128xf32> to vector<16x32xf32>
    %cst_82 = arith.constant dense<0.000000e+00> : vector<16x16xf32>
    %199 = tpu.matmul %193, %195, %cst_82 {dimension_numbers = #tpu.dot_dimension_numbers<[1], [1], [0], [0], [0, 0, 1, 0], [], []>} : vector<16x32xbf16>, vector<16x32xbf16>, vector<16x16xf32> -> vector<16x16xf32>
    %200 = arith.addf %199, %7 : vector<16x16xf32>
    %cst_83 = arith.constant dense<0xFF800000> : vector<16xf32>
    %201 = vector.multi_reduction <maximumf>, %200, %cst_83 [1] : vector<16x16xf32> to vector<16xf32>
    %202 = vector.shape_cast %201 : vector<16xf32> to vector<16x1xf32>
    %203 = vector.broadcast %202 : vector<16x1xf32> to vector<16x16xf32>
    %204 = arith.subf %200, %203 : vector<16x16xf32>
    %205 = math.exp %204 : vector<16x16xf32>
    %206 = arith.mulf %205, %3 : vector<16x16xf32>
    %cst_84 = arith.constant dense<0.000000e+00> : vector<16xf32>
    %207 = vector.multi_reduction <add>, %206, %cst_84 [1] : vector<16x16xf32> to vector<16xf32>
    %208 = vector.shape_cast %207 : vector<16xf32> to vector<16x1xf32>
    %cst_85 = arith.constant 1.000000e-30 : f32
    %209 = vector.broadcast %cst_85 : f32 to vector<16x1xf32>
    %210 = arith.maximumf %208, %209 : vector<16x1xf32>
    %211 = tpu.reciprocal %210 {approx = true} : vector<16x1xf32> -> vector<16x1xf32>
    %212 = vector.broadcast %211 : vector<16x1xf32> to vector<16x16xf32>
    %213 = arith.mulf %206, %212 : vector<16x16xf32>
    %214 = arith.truncf %213 : vector<16x16xf32> to vector<16x16xbf16>
    %cst_86 = arith.constant dense<0.000000e+00> : vector<16x32xf32>
    %215 = tpu.matmul %214, %197, %cst_86 {dimension_numbers = #tpu.dot_dimension_numbers<[1], [0], [0], [1], [0, 0, 1, 1], [], []>} : vector<16x16xbf16>, vector<16x32xbf16>, vector<16x32xf32> -> vector<16x32xf32>
    %216 = arith.addf %215, %198 : vector<16x32xf32>
    %cst_87 = arith.constant dense<0.000000e+00> : vector<32xf32>
    %217 = vector.multi_reduction <add>, %216, %cst_87 [0] : vector<16x32xf32> to vector<32xf32>
    %218 = vector.shape_cast %217 : vector<32xf32> to vector<1x32xf32>
    %cst_88 = arith.constant 1.600000e+01 : f32
    %219 = vector.broadcast %cst_88 : f32 to vector<1x32xf32>
    %220 = arith.divf %218, %219 : vector<1x32xf32>
    %221 = vector.broadcast %220 : vector<1x32xf32> to vector<16x32xf32>
    %222 = arith.subf %216, %221 : vector<16x32xf32>
    %223 = arith.mulf %222, %222 : vector<16x32xf32>
    %cst_89 = arith.constant dense<0.000000e+00> : vector<32xf32>
    %224 = vector.multi_reduction <add>, %223, %cst_89 [0] : vector<16x32xf32> to vector<32xf32>
    %225 = vector.shape_cast %224 : vector<32xf32> to vector<1x32xf32>
    %cst_90 = arith.constant 1.600000e+01 : f32
    %226 = vector.broadcast %cst_90 : f32 to vector<1x32xf32>
    %227 = arith.divf %225, %226 : vector<1x32xf32>
    %c3_91 = arith.constant 3 : index
    %c0_92 = arith.constant 0 : index
    %c0_93 = arith.constant 0 : index
    %228 = vector.load %arg6[%c3_91, %c0_92, %c0_93] : memref<4x1x32xf32, #tpu.memory_space<vmem>>, vector<1x1x32xf32>
    %229 = vector.shape_cast %228 : vector<1x1x32xf32> to vector<1x32xf32>
    %cst_94 = arith.constant 9.99999974E-6 : f32
    %230 = vector.broadcast %cst_94 : f32 to vector<1x32xf32>
    %231 = arith.addf %227, %230 : vector<1x32xf32>
    %232 = math.rsqrt %231 : vector<1x32xf32>
    %233 = vector.broadcast %232 : vector<1x32xf32> to vector<16x32xf32>
    %234 = arith.mulf %222, %233 : vector<16x32xf32>
    %235 = vector.broadcast %229 : vector<1x32xf32> to vector<16x32xf32>
    %236 = arith.mulf %235, %234 : vector<16x32xf32>
    %c3_95 = arith.constant 3 : index
    %c0_96 = arith.constant 0 : index
    %c0_97 = arith.constant 0 : index
    %237 = vector.load %arg7[%c3_95, %c0_96, %c0_97] : memref<4x1x32xf32, #tpu.memory_space<vmem>>, vector<1x1x32xf32>
    %238 = vector.shape_cast %237 : vector<1x1x32xf32> to vector<1x32xf32>
    %239 = vector.broadcast %238 : vector<1x32xf32> to vector<16x32xf32>
    %240 = arith.addf %236, %239 : vector<16x32xf32>
    %cst_98 = arith.constant 0.000000e+00 : f32
    %241 = vector.broadcast %cst_98 : f32 to vector<16x32xf32>
    %242 = arith.maximumf %240, %241 : vector<16x32xf32>
    %243 = arith.truncf %242 : vector<16x32xf32> to vector<16x32xbf16>
    %c0_99 = arith.constant 0 : index
    %c0_100 = arith.constant 0 : index
    %c0_101 = arith.constant 0 : index
    %244 = vector.load %arg3[%c0_99, %c0_100, %c0_101] : memref<1x2x16xf32, #tpu.memory_space<vmem>>, vector<1x2x16xf32>
    %245 = vector.shape_cast %244 : vector<1x2x16xf32> to vector<2x16xf32>
    %246 = arith.extf %243 : vector<16x32xbf16> to vector<16x32xf32>
    %cst_102 = arith.constant dense<0.000000e+00> : vector<2x32xf32>
    %247 = tpu.matmul %245, %246, %cst_102 {dimension_numbers = #tpu.dot_dimension_numbers<[1], [0], [0], [1], [0, 0, 1, 1], [], []>} : vector<2x16xf32>, vector<16x32xf32>, vector<2x32xf32> -> vector<2x32xf32>
    %c0_103 = arith.constant 0 : index
    %c0_104 = arith.constant 0 : index
    %248 = vector.load %arg8[%c0_103, %c0_104] : memref<32x3xf32, #tpu.memory_space<vmem>>, vector<32x3xf32>
    %cst_105 = arith.constant dense<0.000000e+00> : vector<2x3xf32>
    %249 = tpu.matmul %247, %248, %cst_105 {dimension_numbers = #tpu.dot_dimension_numbers<[1], [0], [0], [1], [0, 0, 1, 1], [], []>} : vector<2x32xf32>, vector<32x3xf32>, vector<2x3xf32> -> vector<2x3xf32>
    %c0_106 = arith.constant 0 : index
    %c0_107 = arith.constant 0 : index
    %250 = vector.load %arg9[%c0_106, %c0_107] : memref<1x3xf32, #tpu.memory_space<vmem>>, vector<1x3xf32>
    %251 = vector.broadcast %250 : vector<1x3xf32> to vector<2x3xf32>
    %252 = arith.addf %249, %251 : vector<2x3xf32>
    %c0_108 = arith.constant 0 : index
    %c0_109 = arith.constant 0 : index
    %c0_110 = arith.constant 0 : index
    %253 = vector.load %arg10[%c0_108, %c0_109, %c0_110] : memref<1x2x3xf32, #tpu.memory_space<vmem>>, vector<1x2x3xf32>
    %254 = vector.shape_cast %253 : vector<1x2x3xf32> to vector<2x3xf32>
    %255 = vector.shape_cast %252 : vector<2x3xf32> to vector<1x2x3xf32>
    tpu.vector_store %arg10[%c0_108, %c0_109, %c0_110], %255 {strides = array<i32>} : memref<1x2x3xf32, #tpu.memory_space<vmem>>, vector<1x2x3xf32>,
    return
  }
  func.func @transform_0(%arg0: i32) -> (i32, i32, i32) {
    %c0_i32 = arith.constant 0 : i32
    %c0_i32_0 = arith.constant 0 : i32
    %c0_i32_1 = arith.constant 0 : i32
    return %arg0, %c0_i32, %c0_i32_0 : i32, i32, i32
  }
  func.func @transform_1(%arg0: i32) -> (i32, i32, i32) {
    %c0_i32 = arith.constant 0 : i32
    %c0_i32_0 = arith.constant 0 : i32
    %c0_i32_1 = arith.constant 0 : i32
    return %arg0, %c0_i32, %c0_i32_0 : i32, i32, i32
  }
  func.func @transform_2(%arg0: i32) -> (i32, i32, i32) {
    %c0_i32 = arith.constant 0 : i32
    %c0_i32_0 = arith.constant 0 : i32
    %c0_i32_1 = arith.constant 0 : i32
    return %arg0, %c0_i32, %c0_i32_0 : i32, i32, i32
  }
  func.func @transform_3(%arg0: i32) -> (i32, i32, i32) {
    %c0_i32 = arith.constant 0 : i32
    %c0_i32_0 = arith.constant 0 : i32
    %c0_i32_1 = arith.constant 0 : i32
    %c0_i32_2 = arith.constant 0 : i32
    return %c0_i32, %c0_i32_0, %c0_i32_1 : i32, i32, i32
  }
  func.func @transform_4(%arg0: i32) -> (i32, i32, i32) {
    %c0_i32 = arith.constant 0 : i32
    %c0_i32_0 = arith.constant 0 : i32
    %c0_i32_1 = arith.constant 0 : i32
    %c0_i32_2 = arith.constant 0 : i32
    return %c0_i32, %c0_i32_0, %c0_i32_1 : i32, i32, i32
  }
  func.func @transform_5(%arg0: i32) -> (i32, i32, i32) {
    %c0_i32 = arith.constant 0 : i32
    %c0_i32_0 = arith.constant 0 : i32
    %c0_i32_1 = arith.constant 0 : i32
    %c0_i32_2 = arith.constant 0 : i32
    return %c0_i32, %c0_i32_0, %c0_i32_1 : i32, i32, i32
  }
  func.func @transform_6(%arg0: i32) -> (i32, i32, i32) {
    %c0_i32 = arith.constant 0 : i32
    %c0_i32_0 = arith.constant 0 : i32
    %c0_i32_1 = arith.constant 0 : i32
    %c0_i32_2 = arith.constant 0 : i32
    return %c0_i32, %c0_i32_0, %c0_i32_1 : i32, i32, i32
  }
  func.func @transform_7(%arg0: i32) -> (i32, i32) {
    %c0_i32 = arith.constant 0 : i32
    %c0_i32_0 = arith.constant 0 : i32
    %c0_i32_1 = arith.constant 0 : i32
    return %c0_i32, %c0_i32_0 : i32, i32
  }
  func.func @transform_8(%arg0: i32) -> (i32, i32) {
    %c0_i32 = arith.constant 0 : i32
    %c0_i32_0 = arith.constant 0 : i32
    %c0_i32_1 = arith.constant 0 : i32
    return %c0_i32, %c0_i32_0 : i32, i32
  }
  func.func @transform_9(%arg0: i32) -> (i32, i32, i32) {
    %c0_i32 = arith.constant 0 : i32
    %c0_i32_0 = arith.constant 0 : i32
    %c0_i32_1 = arith.constant 0 : i32
    return %arg0, %c0_i32, %c0_i32_0 : i32, i32, i32
  }
}

</mosaic_0001>

<bundles_post_ra>
// kernel: tpu_custom_call.1
= control target key start
LH: loop header
LB: loop body
LE: loop exit
PB: predicated region body
PF: predicated region fallthrough
CT: control target
= control target key end

     0   :  { %s2192_s0 = inlined_call_operand.hbm [shape: bf16[2,16,32], index: 0, kind: input, shape index: {}]   ;;  %s2193_s1 = inlined_call_operand.vmem [shape: f32[2,16,16], index: 1, kind: input, shape index: {}]   ;;  %s2194_s2 = inlined_call_operand.vmem [shape: f32[2,2,16], index: 2, kind: input, shape index: {}]   ;;  %s2195_s3 = inlined_call_operand.hbm [shape: bf16[4,32,128], index: 3, kind: input, shape index: {}]   ;;  %s2196_s4 = inlined_call_operand.hbm [shape: f32[4,1,128], index: 4, kind: input, shape index: {}]   ;;  %s2197_s5 = inlined_call_operand.hbm [shape: f32[4,1,32], index: 5, kind: input, shape index: {}]   ;;  %s2198_s6 = inlined_call_operand.hbm [shape: f32[4,1,32], index: 6, kind: input, shape index: {}]   ;;  %s2199_s7 = inlined_call_operand.vmem [shape: f32[32,3], index: 7, kind: input, shape index: {}]   ;;  %s2200_s8 = inlined_call_operand.vmem [shape: f32[1,3], index: 8, kind: input, shape index: {}]   ;;  %s2201_s9 = inlined_call_operand.hbm [shape: f32[2,2,3], index: 9, kind: output, shape index: {}]  }
   0x1   :  { %2204 = sst [smem:[#allocation16_spill]] %s2195_s3 }
   0x2   :  { %2205 = sst [smem:[#allocation17_spill]] %s2196_s4 }
   0x3   :  { %2206 = sst [smem:[#allocation18_spill]] %s2197_s5 }
   0x4   :  { %14 = vsyncpa [#allocation3], 0 }
   0x5   :  { %16 = vsyncpa [#allocation3 + $0x1], 0 }
   0x6   :  { %17 = vsyncpa [#allocation6], 0 }
   0x7   :  { %18 = vsyncpa [#allocation9], 0 }
   0x8   :  { %19 = vsyncpa [#allocation4], 0 }
   0x9   :  { %21 = vsyncpa [#allocation4 + $0x1], 0  ;;  %s1893_s30 = smov 0   ;;  %s1895_s10 = smov 0  }
   0xa   :  { %s1897_s11 = smov 0   ;;  %s1899_s12 = smov 0  }
   0xb LB: > { %s1914_s13 = sadd.s32 4294967295, %s1829_s12   ;;  %s1370_s14 = sadd.s32 4294967294, %s1829_s12   ;;  %s1829_s12 = sphi %s1899_s12, %s2222_s12   ;;  %s1825_s11 = sphi %s1897_s11, %s2221_s11   ;;  %s1821_s10 = sphi %s1895_s10, %s2220_s10   ;;  %s1817_s30 = sphi %s1893_s30, %s2219_s30  }
   0xc   : > { %p47_p0 = scmp.ne.s32.totalorder %s1821_s10, %s1817_s30  ;;  %p48_p1 = scmp.eq.s32.totalorder %s1914_s13, 0 }
   0xd   : > { %p249_p2 = scmp.eq.s32.totalorder %s1914_s13, 1  ;;  %p255_p3 = scmp.eq.s32.totalorder %s1370_s14, 1 }
   0xe   : > { %p1923_p4 = por %p48_p1, %p47_p0  ;;  %p1371_p5 = scmp.ge.s32.totalorder %s1829_s12, 1 }
   0xf   : > { %p1928_p6 = por %p255_p3, %p47_p0  ;;  %p262_p7 = scmp.lt.s32.totalorder %s1829_s12, 3 }
  0x10   : > { %s2209_s3 = sld [smem:[#allocation16_spill]]  ;;  %s1831_s21 = smov [#allocation5]  }
  0x11   : > { %p1936_p8 = pnand %p1371_p5, %p262_p7  ;;  %s275_s22 = sshll.u32 %s1831_s21, 4  ;;  %s276_s22 = int_to_ptr.vmem [resolvable:$true] %s275_s22 }
  0x12   : > { %s2212_s5 = sld [smem:[#allocation18_spill]]  ;;  %s2202_s27 = smov 64  }
  0x13   : > { %p1475_p9 = pneg %p1936_p8  ;;  %s2203_s28 = smov 4  }
  0x14   : > { %s1834_s29 = smov [#allocation8]   ;;  %s2213_s4 = sld [smem:[#allocation17_spill]] }
  0x15   : > { %p1944_p10 = pnand %p1475_p9, %p48_p1  ;;  %s303_s14 = sshll.u32 %s1834_s29, 4  ;;  %s304_s14 = int_to_ptr.vmem [resolvable:$true] %s303_s14 }
  0x16   : > { %s273_s19 = sshll.u32 %s2209_s3, 4  ;;  %s1835_s24 = smov 16   ;;  %s274_s19 = int_to_ptr.hbm [resolvable:$true] %s273_s19 }
  0x17   : > { %1478 = dma.hbm_to_vmem [thread:$0]  (!%p1944_p10), %s274_s19, 1024, %s276_s22, [#allocation6], %s2202_s27, %s2202_s27, %s2203_s28  }
  0x18   : > { %s301_s26 = sshll.u32 %s2212_s5, 4  ;;  %s1836_s25 = smov 1   ;;  %s302_s26 = int_to_ptr.hbm [resolvable:$true] %s301_s26 }
  0x19   : > { %1484 = dma.hbm_to_vmem [thread:$0]  (!%p1944_p10), %s302_s26, 64, %s304_s14, [#allocation9], %s1835_s24, %s1835_s24, %s1836_s25  }
  0x1a   : > { %s287_s21 = sshll.u32 %s2213_s4, 4  ;;  %s315_s29 = sshll.u32 %s2198_s6, 4  ;;  %s288_s21 = int_to_ptr.hbm [resolvable:$true] %s287_s21  ;;  %s316_s29 = int_to_ptr.hbm [resolvable:$true] %s315_s29 }
  0x1b   : > { %s1837_s17 = smov [#allocation7]   ;;  %s1838_s27 = smov [#allocation10]  }
  0x1c   : > { %s289_s18 = sshll.u32 %s1837_s17, 4  ;;  %s317_s28 = sshll.u32 %s1838_s27, 4  ;;  %s290_s18 = int_to_ptr.vmem [resolvable:$true] %s289_s18  ;;  %s318_s28 = int_to_ptr.vmem [resolvable:$true] %s317_s28 }
  0x1d   : > { %1481 = dma.hbm_to_vmem [thread:$0]  (!%p1944_p10), %s288_s21, 64, %s290_s18, [#allocation6], %s1835_s24, %s1835_s24, %s1836_s25  }
  0x1e   : > { %1487 = dma.hbm_to_vmem [thread:$0]  (!%p1944_p10), %s316_s29, 64, %s318_s28, [#allocation9], %s1835_s24, %s1835_s24, %s1836_s25  }
  0x1f   : > { %s1970_s26 = sadd.s32 1, %s1829_s12   ;;  %s34_s14 = sadd.s32 1, %s1825_s11 }
  0x20   : > { %s31_s19 = ssub.s32 %s1829_s12, %s1970_s26  ;;  %p41_p12 = scmp.ne.s32.totalorder %s1825_s11, %s1821_s10 }
  0x21   : > { %p32_p13 = scmp.eq.s32.totalorder %s31_s19, 0  ;;  %p42_p0 = scmp.eq.s32.totalorder %s1829_s12, 0 }
  0x22   : > { %p1980_p3 = por %p249_p2, %p41_p12  ;;  %p1500_p5 = scmp.lt.s32.totalorder %s1829_s12, 2 }
  0x23   : > { %s1986_s21 = scalar_select %p32_p13, %s1825_s11, %s34_s14  }
  0x24   : > { %p43_p7 = por %p42_p0, %p41_p12  ;;  %s337_s27 = sand.u32 1, %s1825_s11  }
  0x25   : > { %s1377_s23 = sshll.u32 %s337_s27, 3  ;;  %s1444_s28 = sshll.u32 %s1829_s12, 3 }
  0x26   : > { %s346_s29 = scalar_lea.hbm %s2192_s0, %s1444_s28  ;;  %s341_s17 = scalar_lea.vmem [#allocation2], %s1377_s23 }
  0x27   : > { %s349_s18 = sshll.u32 %s341_s17, 4  ;;  %s347_s19 = sshll.u32 %s346_s29, 4  ;;  %s350_s18 = int_to_ptr.vmem [resolvable:$true] %s349_s18  ;;  %s348_s19 = int_to_ptr.hbm [resolvable:$true] %s347_s19 }
  0x28   : > { %p1993_p2 = pnand %p1500_p5, %p43_p7  ;;  %s338_s14 = scalar_lea.sflag [#allocation3], %s337_s27 }
  0x29   : > { %s1725_s4 = sshra.s32 %s348_s19, 4  ;;  %s1732_s24 = scalar_lea.hbm %s2192_s0, 16  ;;  %s1726_s4 = int_to_ptr.hbm [resolvable:$true] %s1725_s4 }
  0x2a   : > { %s1727_s5 = scalar_lea.hbm %s1726_s4, 8  ;;  %p1729_p10 = pneg %p1993_p2 }
  0x2b   : > { %p1728_p9 = scmp.ne.s32.totalorder %s1726_s4, %s1727_s5  ;;  %p1733_p0 = scmp.lt.s32.totalorder %s1726_s4, %s2192_s0 }
  0x2c   : > { %p1734_p5 = scmp.lt.s32.totalorder %s1732_s24, %s1727_s5 }
  0x2d   : > { %p1730_p12 = pnand %p1729_p10, %p1728_p9 }
  0x2e   : > { %p1735_p7 = por %p1734_p5, %p1733_p0 }
  0x2f   : > { %p1731_p13 = pneg %p1730_p12 }
  0x31   : > { %p1736_p11 = pnand %p1735_p7, %p1731_p13 }
  0x33   : > { %1739 = shalt.err (!%p1736_p11)
}
  0x34   : > { %s2216_s27 = smov 4   ;;  %s2217_s17 = smov 64  }
  0x35   : > { %1491 = dma.hbm_to_vmem [thread:$0]  (!%p1993_p2), %s348_s19, 128, %s350_s18, %s338_s14, %s2217_s17, %s2217_s17, %s2216_s27  }
  0x36   : > { %376 = sbr.rel (%p1936_p8) target bundleno = 3786 (0xeca), region = 56  ;;  %s2013_s28 = sand.u32 (!%p1936_p8), 1, %s1821_s10  }
  0x37   : > { %s1381_s4 = sshll.u32 (!%p1936_p8), %s2013_s28, 3  ;;  %s379_s5 = scalar_lea.sflag (!%p1936_p8), [#allocation3], %s2013_s28 }
  0x38   : > { %s382_s23 = scalar_lea.vmem (!%p1936_p8), [#allocation2], %s1381_s4 }
  0x3b   : > { %1800 = dma.done.wait (%p1923_p4), %s379_s5, 128  }
  0x3c   : > { %1802 = vsyncadd (%p1923_p4), %s379_s5, 4294967168 }
  0x3d   : > { %1804 = dma.done.wait (%p48_p1), [#allocation6], 1088  }
  0x3e   : > { %1806 = vsyncadd (%p48_p1), [#allocation6], 4294966208 }
  0x3f   : > { %1808 = dma.done.wait (%p48_p1), [#allocation9], 128  }
  0x40   : > { %1810 = vsyncadd (%p48_p1), [#allocation9], 4294967168  ;;  %v1448_v0 = vld [vmem:[#allocation5 + $0x8] sm:$0xff]  ;;  %v1447_v1 = vld [vmem:[#allocation5] sm:$0xff]  ;;  %vm490_vm0 = vcmask 261120   ;;  %s1839_s3 = smov 96  }
  0x41   : > { %500 = vmatpush.bf16.msra.mxu0 %v1448_v0  ;;  %v1446_v2 = vld [vmem:[%s382_s23] sm:$0xff]  ;;  %v1550_v4 = vld [vmem:[#allocation7] ss:$0 sm:$0xff]  ;;  %p447_p1 = scmp.lt.s32.totalorder %s1914_s13, 1  ;;  %vm532_vm1 = vcmask 130048   ;;  %s1840_s24 = smov 32  }
  0x42   : > { %s1841_s25 = smov 64   ;;  %v1842_v45 = vmov 16.0   ;;  %s1441_s29 = sshll.u32 %s1914_s13, 1  ;;  %vm1220_vm15 = vcmask 17408  }
  0x43   : > { %s2035_s15 = scalar_select %p447_p1, %s1914_s13, 1 }
  0x44   : > { %s1233_s17 = scalar_lea.hbm %s2201_s9, %s1441_s29 }
  0x45   : > { %501 = vmatpush.bf16.msra.mxu0 %v1447_v1  ;;  %s1445_s20 = sshll.u32 %s2035_s15, 4  ;;  %s1389_s18 = sshll.u32 %s2035_s15, 1 }
  0x46   : > { %s451_s14 = scalar_lea.vmem %s2193_s1, %s1445_s20  ;;  %s1237_s20 = sshll.u32 %s1233_s17, 4  ;;  %s1238_s20 = int_to_ptr.hbm [resolvable:$true] %s1237_s20 }
  0x47   : > { %v2041_v11 = vld [vmem:[%s451_s14] sm:$0xff]  ;;  %v2046_v14 = vld [vmem:[%s451_s14 + $0x8] sm:$0xff]  ;;  %s1769_s13 = sshra.s32 %s1238_s20, 4  ;;  %s1770_s13 = int_to_ptr.hbm [resolvable:$true] %s1769_s13 }
  0x48   : > { %1402 = vmatmul.msk.bf16.vlgmr.msra.gmra.mxu0 %vm490_vm0, %v1446_v2  ;;  %v461_v12 = vsub.f32 1.0, %v2041_v11  ;;  %v462_v17 = vsub.f32 1.0, %v2046_v14  ;;  %s1771_s19 = scalar_lea.hbm %s1770_s13, 2  ;;  %p1776_p2 = scmp.lt.s32.totalorder %s1770_s13, %s2201_s9 }
  0x49   : > { %p1772_p4 = scmp.ne.s32.totalorder %s1770_s13, %s1771_s19 }
  0x4a   : > { %v2044_v13 = vmul.f32 -1e+30, %v461_v12  ;;  %v2051_v19 = vmul.f32 -1e+30, %v462_v17 }
  0x4b   : > { %p1773_p8 = pnand %p1772_p4, %p1980_p3 }
  0x4d   : > { %p1774_p11 = pneg %p1773_p8 }
  0xc5   : > { %v503_v3 = vpop.f32.mrf.mxu0 }
  0xc6   : > { %v504_v6 = vadd.f32 %v1550_v4, %v503_v3 }
  0xcd   : > { %v505_v5 = vpop.f32.mrf.mxu0 }
  0xce   : > { %v506_v7 = vadd.f32 %v1550_v4, %v505_v5 }
  0xd0   : > { %v508_v8 = vpack.c.bf16 %v506_v7, %v504_v6 }
  0xd2   : > { %510 = vrot.lane.b32.xlu0 %v508_v8, %s1839_s3 }
 0x144   : > { %v511_v9 = vpop.permute.xlu0 %510 }
 0x145   : > { %v516_v10 = vsel %vm490_vm0, %v511_v9, 0 }
 0x146   : > { %525 = vmatpush.bf16.xpose.msra.mxu1 %v516_v10 }
 0x14d   : > { %1403 = vmatmul.msk.bf16.vlgmr.msra.gmra.mxu1 %vm490_vm0, %v508_v8 }
 0x1ca   : > { %v527_v15 = vpop.f32.mrf.mxu1 }
 0x1cb   : > { %v528_v16 = vadd.f32 %v527_v15, %v2044_v13 }
 0x1cd   : > { %v533_v18 = vsel %vm532_vm1, %v528_v16, -inf }
 0x1ce   : > { %534 = vmax.xlane.f32.xlu0 %v533_v18  ;;  %v1449_v18 = vld [vmem:[#allocation5 + $0x10] sm:$0xff] }
 0x1d2   : > { %v529_v20 = vpop.f32.mrf.mxu1 }
 0x1d3   : > { %v530_v21 = vadd.f32 %v529_v20, %v2051_v19 }
 0x1d5   : > { %v536_v22 = vsel %vm532_vm1, %v530_v21, -inf }
 0x1d6   : > { %537 = vmax.xlane.f32.xlu1 %v536_v22 }
 0x241   : > { %v535_v23 = vpop.xlane.xlu0 %534 }
 0x242   : > { %v539_v24 = vsub.f32 %v528_v16, %v535_v23  ;;  %v1450_v16 = vld [vmem:[#allocation5 + $0x18] sm:$0xff] }
 0x243   : > { %678 = vmatpush.bf16.msra.mxu3 %v1450_v16 }
 0x244   : > { %v541_v25 = vmul.f32 1.442695, %v539_v24 }
 0x246   : > { %1563 = vpow2.f32 %v541_v25 }
 0x247   : > { %679 = vmatpush.bf16.msra.mxu3 %v1449_v18 }
 0x249   : > { %v538_v26 = vpop.xlane.xlu1 %537 }
 0x24a   : > { %v540_v27 = vsub.f32 %v530_v21, %v538_v26 }
 0x24c   : > { %v1564_v28 = vpop.eup %1563  ;;  %v543_v29 = vmul.f32 1.442695, %v540_v27 }
 0x24d   : > { %v545_v30 = vmul.f32 %v1564_v28, %v2041_v11 }
 0x24e   : > { %1565 = vpow2.f32 %v543_v29 }
 0x24f   : > { %v547_v31 = vsel %vm532_vm1, %v545_v30, 0.0 }
 0x250   : > { %548 = vadd.xlane.f32.xlu1 %v547_v31  ;;  %v1551_v31 = vld [vmem:[#allocation8] ss:$0 sm:$0xff] }
 0x254   : > { %v1566_v32 = vpop.eup %1565 }
 0x255   : > { %v546_v33 = vmul.f32 %v1566_v32, %v2046_v14 }
 0x257   : > { %v550_v34 = vsel %vm532_vm1, %v546_v33, 0.0 }
 0x258   : > { %551 = vadd.xlane.f32.xlu2 %v550_v34 }
 0x269   : > { %565 = vrot.lane.b32.xlu1 %v504_v6, %s1840_s24 }
 0x270   : > { %560 = vrot.lane.b32.xlu2 %v508_v8, %s1841_s25 }
 0x278   : > { %567 = vrot.lane.b32.xlu2 %v506_v7, %s1840_s24 }
 0x2c3   : > { %v549_v35 = vpop.xlane.xlu1 %548 }
 0x2c4   : > { %v553_v36 = vmax.f32 %v549_v35, 1e-30  ;;  %v1552_v35 = vld [vmem:[#allocation10] ss:$0 sm:$0xff] }
 0x2c6   : > { %1567 = vrcp.f32 %v553_v36 }
 0x2cb   : > { %v552_v37 = vpop.xlane.xlu2 %551 }
 0x2cc   : > { %v554_v38 = vmax.f32 %v552_v37, 1e-30  ;;  %v1568_v39 = vpop.eup %1567 }
 0x2cd   : > { %v557_v42 = vmul.f32 %v1568_v39, %v545_v30 }
 0x2ce   : > { %1569 = vrcp.f32 %v554_v38 }
 0x2cf   : > { %1571 = vrcp.f32 %v1842_v45 }
 0x2d3   : > { %v561_v40 = vpop.permute.xlu2 %560 }
 0x2d4   : > { %v1570_v41 = vpop.eup %1569  ;;  %581 = vmatpush.bf16.msra.mxu2 %v561_v40 }
 0x2d5   : > { %v558_v43 = vmul.f32 %v1570_v41, %v546_v33  ;;  %v1572_v47 = vpop.eup %1571 }
 0x2d6   : > { %v598_v50 = vmul.f32 16.0, %v1572_v47  ;;  %vm602_vm2 = vweird.f32 %v1572_v47 }
 0x2d7   : > { %v559_v44 = vpack.c.bf16 %v558_v43, %v557_v42 }
 0x2d8   : > { %v599_v56 = vsub.f32 1.0, %v598_v50 }
 0x2d9   : > { %1404 = vmatmul.msk.bf16.vlgmr.msra.gmra.mxu2 %vm532_vm1, %v559_v44  ;;  %v1553_v44 = vld [vmem:[#allocation7 + $0x1] ss:$0 sm:$0xff] }
 0x2da   : > { %v600_v59 = vmul.f32 %v1572_v47, %v599_v56 }
 0x2db   : > { %v566_v48 = vpop.permute.xlu1 %565  ;;  %v568_v51 = vpop.permute.xlu2 %567 }
 0x2dc   : > { %v601_v62 = vadd.f32 %v1572_v47, %v600_v59 }
 0x2de   : > { %v2065_v1 = vsel %vm602_vm2, %v1572_v47, %v601_v62 }
 0x35c   : > { %v583_v46 = vpop.f32.mrf.mxu2 }
 0x35d   : > { %v584_v49 = vadd.f32 %v583_v46, %v566_v48 }
 0x35f   : > { %v588_v54 = vsel %vm490_vm0, %v584_v49, 0.0 }
 0x364   : > { %v585_v52 = vpop.f32.mrf.mxu2 }
 0x365   : > { %v586_v53 = vadd.f32 %v585_v52, %v568_v51 }
 0x367   : > { %v589_v55 = vsel %vm490_vm0, %v586_v53, 0.0 }
 0x368   : > { %v590_v57 = vadd.f32 %v589_v55, %v588_v54 }
 0x36a   : > { %v591_v58 = vrot.slane %v590_v57, 4 }
 0x36c   : > { %v592_v60 = vadd.f32 %v591_v58, %v590_v57 }
 0x36e   : > { %v593_v61 = vrot.slane %v592_v60, 2 }
 0x370   : > { %v594_v63 = vadd.f32 %v593_v61, %v592_v60 }
 0x372   : > { %v595_v0 = vrot.slane %v594_v63, 1 }
 0x374   : > { %v596_v2 = vadd.f32 %v595_v0, %v594_v63 }
 0x376   : > { %v604_v3 = vmul.f32 %v2065_v1, %v596_v2 }
 0x378   : > { %v605_v4 = vsub.f32 %v584_v49, %v604_v3  ;;  %v606_v5 = vsub.f32 %v586_v53, %v604_v3 }
 0x37a   : > { %v607_v6 = vmul.f32 %v605_v4, %v605_v4  ;;  %v608_v7 = vmul.f32 %v606_v5, %v606_v5 }
 0x37c   : > { %v609_v8 = vsel %vm490_vm0, %v607_v6, 0.0  ;;  %v610_v9 = vsel %vm490_vm0, %v608_v7, 0.0 }
 0x37d   : > { %v611_v10 = vadd.f32 %v610_v9, %v609_v8 }
 0x37f   : > { %v612_v12 = vrot.slane %v611_v10, 4 }
 0x381   : > { %v613_v15 = vadd.f32 %v612_v12, %v611_v10 }
 0x383   : > { %v614_v17 = vrot.slane %v613_v15, 2 }
 0x385   : > { %v615_v20 = vadd.f32 %v614_v17, %v613_v15 }
 0x387   : > { %v616_v21 = vrot.slane %v615_v20, 1 }
 0x389   : > { %v617_v22 = vadd.f32 %v616_v21, %v615_v20 }
 0x38b   : > { %v618_v23 = vmul.f32 %v617_v22, %v2065_v1 }
 0x38d   : > { %v620_v24 = vadd.f32 1e-05, %v618_v23 }
 0x38f   : > { %1573 = vrsqrt.f32 %v620_v24  ;;  %vm627_vm4 = vweird.f32 %v620_v24 }
 0x395   : > { %v1574_v25 = vpop.eup %1573 }
 0x396   : > { %v622_v26 = vmul.f32 %v1574_v25, %v620_v24  ;;  %vm628_vm3 = vweird.f32 %v1574_v25 }
 0x397   : > { %vm629_vm5 = vmor %vm627_vm4, %vm628_vm3 }
 0x398   : > { %v623_v27 = vmul.f32 %v1574_v25, %v622_v26 }
 0x39a   : > { %v624_v28 = vmul.f32 0.5, %v623_v27 }
 0x39c   : > { %v625_v29 = vsub.f32 1.5, %v624_v28 }
 0x39e   : > { %v626_v30 = vmul.f32 %v1574_v25, %v625_v29 }
 0x3a0   : > { %v630_v32 = vsel %vm629_vm5, %v1574_v25, %v626_v30 }
 0x3a1   : > { %v631_v33 = vmul.f32 %v630_v32, %v605_v4  ;;  %v632_v34 = vmul.f32 %v630_v32, %v606_v5 }
 0x3a3   : > { %v637_v36 = vmul.f32 %v1551_v31, %v632_v34  ;;  %v636_v37 = vmul.f32 %v1551_v31, %v631_v33 }
 0x3a5   : > { %v642_v38 = vadd.f32 %v1552_v35, %v636_v37  ;;  %v643_v39 = vadd.f32 %v1552_v35, %v637_v36 }
 0x3a7   : > { %v644_v40 = vmax.f32 %v642_v38, 0.0  ;;  %v645_v41 = vmax.f32 %v643_v39, 0.0 }
 0x3a9   : > { %v646_v42 = vpack.c.bf16 %v645_v41, %v644_v40 }
 0x3ab   : > { %1413 = vmatmul.msk.bf16.vlgmr.msra.gmra.mxu3 %vm490_vm0, %v646_v42 }
 0x42e   : > { %v681_v43 = vpop.f32.mrf.mxu3 }
 0x42f   : > { %v682_v46 = vadd.f32 %v1553_v44, %v681_v43 }
 0x436   : > { %v683_v45 = vpop.f32.mrf.mxu3 }
 0x437   : > { %v684_v47 = vadd.f32 %v1553_v44, %v683_v45  ;;  %v1452_v45 = vld [vmem:[#allocation5 + $0x28] sm:$0xff] }
 0x438   : > { %850 = vmatpush.bf16.msrb.mxu1 %v1452_v45 }
 0x439   : > { %v686_v48 = vpack.c.bf16 %v684_v47, %v682_v46 }
 0x43b   : > { %688 = vrot.lane.b32.xlu2 %v686_v48, %s1839_s3 }
 0x495   : > { %v689_v49 = vpop.permute.xlu2 %688 }
 0x496   : > { %v694_v50 = vsel %vm490_vm0, %v689_v49, 0 }
 0x497   : > { %703 = vmatpush.bf16.xpose.msrb.mxu2 %v694_v50 }
 0x49e   : > { %1414 = vmatmul.msk.bf16.vlgmr.msrb.gmra.mxu2 %vm490_vm0, %v686_v48 }
 0x521   : > { %v705_v51 = vpop.f32.mrf.mxu2 }
 0x522   : > { %v706_v52 = vadd.f32 %v705_v51, %v2044_v13 }
 0x524   : > { %v710_v53 = vsel %vm532_vm1, %v706_v52, -inf }
 0x525   : > { %711 = vmax.xlane.f32.xlu1 %v710_v53 }
 0x529   : > { %v707_v54 = vpop.f32.mrf.mxu2 }
 0x52a   : > { %v708_v55 = vadd.f32 %v707_v54, %v2051_v19 }
 0x52c   : > { %v713_v56 = vsel %vm532_vm1, %v708_v55, -inf }
 0x52d   : > { %714 = vmax.xlane.f32.xlu2 %v713_v56 }
 0x53e   : > { %742 = vrot.lane.b32.xlu1 %v682_v46, %s1840_s24 }
 0x598   : > { %v712_v57 = vpop.xlane.xlu1 %711 }
 0x599   : > { %v716_v58 = vsub.f32 %v706_v52, %v712_v57 }
 0x59b   : > { %v718_v59 = vmul.f32 1.442695, %v716_v58 }
 0x59d   : > { %1575 = vpow2.f32 %v718_v59  ;;  %v1554_v59 = vld [vmem:[#allocation8 + $0x1] ss:$0 sm:$0xff] }
 0x5a0   : > { %v715_v60 = vpop.xlane.xlu2 %714 }
 0x5a1   : > { %v717_v61 = vsub.f32 %v708_v55, %v715_v60 }
 0x5a3   : > { %v1576_v62 = vpop.eup %1575  ;;  %v720_v63 = vmul.f32 1.442695, %v717_v61 }
 0x5a4   : > { %v722_v0 = vmul.f32 %v1576_v62, %v2041_v11 }
 0x5a5   : > { %1577 = vpow2.f32 %v720_v63  ;;  %v1555_v63 = vld [vmem:[#allocation10 + $0x1] ss:$0 sm:$0xff] }
 0x5a6   : > { %v724_v2 = vsel %vm532_vm1, %v722_v0, 0.0 }
 0x5a7   : > { %725 = vadd.xlane.f32.xlu0 %v724_v2 }
 0x5ab   : > { %v1578_v3 = vpop.eup %1577 }
 0x5ac   : > { %v723_v4 = vmul.f32 %v1578_v3, %v2046_v14 }
 0x5ae   : > { %v727_v5 = vsel %vm532_vm1, %v723_v4, 0.0 }
 0x5af   : > { %728 = vadd.xlane.f32.xlu0 %v727_v5 }
 0x5b0   : > { %v743_v21 = vpop.permute.xlu1 %742 }
 0x5c3   : > { %737 = vrot.lane.b32.xlu0 %v686_v48, %s1841_s25  ;;  %v1451_v48 = vld [vmem:[#allocation5 + $0x20] sm:$0xff] }
 0x5c4   : > { %851 = vmatpush.bf16.msrb.mxu1 %v1451_v48 }
 0x5cb   : > { %744 = vrot.lane.b32.xlu0 %v684_v47, %s1840_s24 }
 0x61a   : > { %v726_v6 = vpop.xlane.xlu0 %725 }
 0x61b   : > { %v730_v9 = vmax.f32 %v726_v6, 1e-30 }
 0x622   : > { %v729_v7 = vpop.xlane.xlu0 %728 }
 0x623   : > { %v731_v8 = vmax.f32 %v729_v7, 1e-30 }
 0x625   : > { %1579 = vrcp.f32 %v731_v8 }
 0x626   : > { %1581 = vrcp.f32 %v730_v9  ;;  %v1556_v9 = vld [vmem:[#allocation7 + $0x2] ss:$0 sm:$0xff] }
 0x62b   : > { %v1580_v10 = vpop.eup %1579 }
 0x62c   : > { %v1582_v12 = vpop.eup %1581  ;;  %v735_v15 = vmul.f32 %v1580_v10, %v723_v4 }
 0x62d   : > { %v734_v16 = vmul.f32 %v1582_v12, %v722_v0 }
 0x62f   : > { %v736_v18 = vpack.c.bf16 %v735_v15, %v734_v16 }
 0x635   : > { %v738_v17 = vpop.permute.xlu0 %737 }
 0x636   : > { %758 = vmatpush.bf16.msrb.mxu0 %v738_v17 }
 0x639   : > { %1415 = vmatmul.msk.bf16.vlgmr.msrb.gmra.mxu0 %vm532_vm1, %v736_v18 }
 0x63d   : > { %v745_v23 = vpop.permute.xlu0 %744 }
 0x6b6   : > { %v760_v20 = vpop.f32.mrf.mxu0 }
 0x6b7   : > { %v761_v22 = vadd.f32 %v760_v20, %v743_v21 }
 0x6b9   : > { %v765_v26 = vsel %vm490_vm0, %v761_v22, 0.0 }
 0x6be   : > { %v762_v24 = vpop.f32.mrf.mxu0 }
 0x6bf   : > { %v763_v25 = vadd.f32 %v762_v24, %v745_v23 }
 0x6c1   : > { %v766_v27 = vsel %vm490_vm0, %v763_v25, 0.0 }
 0x6c2   : > { %v767_v28 = vadd.f32 %v766_v27, %v765_v26 }
 0x6c4   : > { %v768_v29 = vrot.slane %v767_v28, 4 }
 0x6c6   : > { %v769_v30 = vadd.f32 %v768_v29, %v767_v28 }
 0x6c8   : > { %v770_v31 = vrot.slane %v769_v30, 2 }
 0x6ca   : > { %v771_v32 = vadd.f32 %v770_v31, %v769_v30 }
 0x6cc   : > { %v772_v33 = vrot.slane %v771_v32, 1 }
 0x6ce   : > { %v773_v34 = vadd.f32 %v772_v33, %v771_v32 }
 0x6d0   : > { %v774_v35 = vmul.f32 %v773_v34, %v2065_v1 }
 0x6d2   : > { %v775_v36 = vsub.f32 %v761_v22, %v774_v35  ;;  %v776_v37 = vsub.f32 %v763_v25, %v774_v35 }
 0x6d4   : > { %v777_v38 = vmul.f32 %v775_v36, %v775_v36  ;;  %v778_v39 = vmul.f32 %v776_v37, %v776_v37 }
 0x6d6   : > { %v779_v40 = vsel %vm490_vm0, %v777_v38, 0.0  ;;  %v780_v41 = vsel %vm490_vm0, %v778_v39, 0.0 }
 0x6d7   : > { %v781_v42 = vadd.f32 %v780_v41, %v779_v40 }
 0x6d9   : > { %v782_v43 = vrot.slane %v781_v42, 4 }
 0x6db   : > { %v783_v44 = vadd.f32 %v782_v43, %v781_v42 }
 0x6dd   : > { %v784_v46 = vrot.slane %v783_v44, 2 }
 0x6df   : > { %v785_v47 = vadd.f32 %v784_v46, %v783_v44 }
 0x6e1   : > { %v786_v49 = vrot.slane %v785_v47, 1 }
 0x6e3   : > { %v787_v50 = vadd.f32 %v786_v49, %v785_v47 }
 0x6e5   : > { %v788_v51 = vmul.f32 %v787_v50, %v2065_v1 }
 0x6e7   : > { %v791_v52 = vadd.f32 1e-05, %v788_v51 }
 0x6e9   : > { %1583 = vrsqrt.f32 %v791_v52  ;;  %vm798_vm7 = vweird.f32 %v791_v52 }
 0x6ef   : > { %v1584_v53 = vpop.eup %1583 }
 0x6f0   : > { %v793_v54 = vmul.f32 %v1584_v53, %v791_v52  ;;  %vm799_vm6 = vweird.f32 %v1584_v53 }
 0x6f1   : > { %vm800_vm8 = vmor %vm798_vm7, %vm799_vm6 }
 0x6f2   : > { %v794_v55 = vmul.f32 %v1584_v53, %v793_v54 }
 0x6f4   : > { %v795_v56 = vmul.f32 0.5, %v794_v55 }
 0x6f6   : > { %v796_v57 = vsub.f32 1.5, %v795_v56 }
 0x6f8   : > { %v797_v58 = vmul.f32 %v1584_v53, %v796_v57 }
 0x6fa   : > { %v801_v60 = vsel %vm800_vm8, %v1584_v53, %v797_v58 }
 0x6fb   : > { %v802_v61 = vmul.f32 %v801_v60, %v775_v36  ;;  %v803_v62 = vmul.f32 %v801_v60, %v776_v37 }
 0x6fd   : > { %v807_v0 = vmul.f32 %v1554_v59, %v802_v61  ;;  %v808_v2 = vmul.f32 %v1554_v59, %v803_v62 }
 0x6ff   : > { %v815_v3 = vadd.f32 %v1555_v63, %v808_v2  ;;  %v814_v4 = vadd.f32 %v1555_v63, %v807_v0 }
 0x701   : > { %v817_v5 = vmax.f32 %v815_v3, 0.0  ;;  %v816_v6 = vmax.f32 %v814_v4, 0.0 }
 0x703   : > { %v818_v7 = vpack.c.bf16 %v817_v5, %v816_v6 }
 0x705   : > { %1424 = vmatmul.msk.bf16.vlgmr.msrb.gmra.mxu1 %vm490_vm0, %v818_v7 }
 0x782   : > { %v853_v8 = vpop.f32.mrf.mxu1 }
 0x783   : > { %v854_v12 = vadd.f32 %v1556_v9, %v853_v8 }
 0x78a   : > { %v855_v10 = vpop.f32.mrf.mxu1 }
 0x78b   : > { %v856_v15 = vadd.f32 %v1556_v9, %v855_v10  ;;  %v1454_v10 = vld [vmem:[#allocation5 + $0x38] sm:$0xff] }
 0x78c   : > { %1022 = vmatpush.bf16.msra.mxu0 %v1454_v10 }
 0x78d   : > { %v858_v16 = vpack.c.bf16 %v856_v15, %v854_v12 }
 0x78f   : > { %860 = vrot.lane.b32.xlu2 %v858_v16, %s1839_s3 }
 0x7e9   : > { %v861_v17 = vpop.permute.xlu2 %860 }
 0x7ea   : > { %v866_v18 = vsel %vm490_vm0, %v861_v17, 0 }
 0x7eb   : > { %875 = vmatpush.bf16.xpose.msrb.mxu3 %v866_v18 }
 0x7f2   : > { %1425 = vmatmul.msk.bf16.vlgmr.msrb.gmra.mxu3 %vm490_vm0, %v858_v16 }
 0x875   : > { %v877_v20 = vpop.f32.mrf.mxu3 }
 0x876   : > { %v878_v21 = vadd.f32 %v877_v20, %v2044_v13 }
 0x878   : > { %v882_v22 = vsel %vm532_vm1, %v878_v21, -inf }
 0x879   : > { %883 = vmax.xlane.f32.xlu0 %v882_v22 }
 0x87d   : > { %v879_v23 = vpop.f32.mrf.mxu3 }
 0x87e   : > { %v880_v24 = vadd.f32 %v879_v23, %v2051_v19 }
 0x880   : > { %v885_v25 = vsel %vm532_vm1, %v880_v24, -inf }
 0x881   : > { %886 = vmax.xlane.f32.xlu1 %v885_v25 }
 0x89a   : > { %914 = vrot.lane.b32.xlu1 %v854_v12, %s1840_s24 }
 0x8ec   : > { %v884_v26 = vpop.xlane.xlu0 %883 }
 0x8ed   : > { %v888_v27 = vsub.f32 %v878_v21, %v884_v26 }
 0x8ef   : > { %v890_v28 = vmul.f32 1.442695, %v888_v27 }
 0x8f1   : > { %1585 = vpow2.f32 %v890_v28  ;;  %v1557_v28 = vld [vmem:[#allocation8 + $0x2] ss:$0 sm:$0xff] }
 0x8f4   : > { %v887_v29 = vpop.xlane.xlu1 %886 }
 0x8f5   : > { %v889_v30 = vsub.f32 %v880_v24, %v887_v29 }
 0x8f7   : > { %v1586_v31 = vpop.eup %1585  ;;  %v892_v32 = vmul.f32 1.442695, %v889_v30 }
 0x8f8   : > { %v894_v33 = vmul.f32 %v1586_v31, %v2041_v11 }
 0x8f9   : > { %1587 = vpow2.f32 %v892_v32  ;;  %v1558_v32 = vld [vmem:[#allocation10 + $0x2] ss:$0 sm:$0xff] }
 0x8fa   : > { %v896_v34 = vsel %vm532_vm1, %v894_v33, 0.0 }
 0x8fb   : > { %897 = vadd.xlane.f32.xlu2 %v896_v34 }
 0x8ff   : > { %v1588_v35 = vpop.eup %1587 }
 0x900   : > { %v895_v36 = vmul.f32 %v1588_v35, %v2046_v14 }
 0x902   : > { %v899_v37 = vsel %vm532_vm1, %v895_v36, 0.0 }
 0x903   : > { %900 = vadd.xlane.f32.xlu0 %v899_v37 }
 0x90c   : > { %v915_v49 = vpop.permute.xlu1 %914 }
 0x913   : > { %916 = vrot.lane.b32.xlu2 %v856_v15, %s1840_s24 }
 0x917   : > { %909 = vrot.lane.b32.xlu0 %v858_v16, %s1841_s25  ;;  %v1453_v16 = vld [vmem:[#allocation5 + $0x30] sm:$0xff] }
 0x918   : > { %1023 = vmatpush.bf16.msra.mxu0 %v1453_v16 }
 0x96e   : > { %v898_v39 = vpop.xlane.xlu2 %897 }
 0x96f   : > { %v902_v41 = vmax.f32 %v898_v39, 1e-30 }
 0x976   : > { %v901_v38 = vpop.xlane.xlu0 %900  ;;  %v917_v51 = vpop.permute.xlu2 %916 }
 0x977   : > { %v903_v40 = vmax.f32 %v901_v38, 1e-30 }
 0x979   : > { %1589 = vrcp.f32 %v903_v40 }
 0x97a   : > { %1591 = vrcp.f32 %v902_v41  ;;  %v1559_v41 = vld [vmem:[#allocation7 + $0x3] ss:$0 sm:$0xff] }
 0x97f   : > { %v1590_v42 = vpop.eup %1589 }
 0x980   : > { %v1592_v43 = vpop.eup %1591  ;;  %v907_v44 = vmul.f32 %v1590_v42, %v895_v36 }
 0x981   : > { %v906_v45 = vmul.f32 %v1592_v43, %v894_v33 }
 0x983   : > { %v908_v47 = vpack.c.bf16 %v907_v44, %v906_v45 }
 0x989   : > { %v910_v46 = vpop.permute.xlu0 %909 }
 0x98a   : > { %930 = vmatpush.bf16.msra.mxu2 %v910_v46 }
 0x98d   : > { %1426 = vmatmul.msk.bf16.vlgmr.msra.gmra.mxu2 %vm532_vm1, %v908_v47 }
 0xa10   : > { %v932_v48 = vpop.f32.mrf.mxu2 }
 0xa11   : > { %v933_v50 = vadd.f32 %v932_v48, %v915_v49 }
 0xa13   : > { %v937_v54 = vsel %vm490_vm0, %v933_v50, 0.0 }
 0xa18   : > { %v934_v52 = vpop.f32.mrf.mxu2 }
 0xa19   : > { %v935_v53 = vadd.f32 %v934_v52, %v917_v51 }
 0xa1b   : > { %v938_v55 = vsel %vm490_vm0, %v935_v53, 0.0 }
 0xa1c   : > { %v939_v56 = vadd.f32 %v938_v55, %v937_v54 }
 0xa1e   : > { %v940_v57 = vrot.slane %v939_v56, 4 }
 0xa20   : > { %v941_v58 = vadd.f32 %v940_v57, %v939_v56 }
 0xa22   : > { %v942_v59 = vrot.slane %v941_v58, 2 }
 0xa24   : > { %v943_v60 = vadd.f32 %v942_v59, %v941_v58 }
 0xa26   : > { %v944_v61 = vrot.slane %v943_v60, 1 }
 0xa28   : > { %v945_v62 = vadd.f32 %v944_v61, %v943_v60 }
 0xa2a   : > { %v946_v63 = vmul.f32 %v945_v62, %v2065_v1 }
 0xa2c   : > { %v947_v0 = vsub.f32 %v933_v50, %v946_v63  ;;  %v948_v2 = vsub.f32 %v935_v53, %v946_v63 }
 0xa2e   : > { %v949_v3 = vmul.f32 %v947_v0, %v947_v0  ;;  %v950_v4 = vmul.f32 %v948_v2, %v948_v2 }
 0xa30   : > { %v951_v5 = vsel %vm490_vm0, %v949_v3, 0.0  ;;  %v952_v6 = vsel %vm490_vm0, %v950_v4, 0.0 }
 0xa31   : > { %v953_v7 = vadd.f32 %v952_v6, %v951_v5 }
 0xa33   : > { %v954_v8 = vrot.slane %v953_v7, 4 }
 0xa35   : > { %v955_v9 = vadd.f32 %v954_v8, %v953_v7 }
 0xa37   : > { %v956_v12 = vrot.slane %v955_v9, 2 }
 0xa39   : > { %v957_v15 = vadd.f32 %v956_v12, %v955_v9 }
 0xa3b   : > { %v958_v17 = vrot.slane %v957_v15, 1 }
 0xa3d   : > { %v959_v18 = vadd.f32 %v958_v17, %v957_v15 }
 0xa3f   : > { %v960_v20 = vmul.f32 %v959_v18, %v2065_v1 }
 0xa41   : > { %v963_v21 = vadd.f32 1e-05, %v960_v20 }
 0xa43   : > { %1593 = vrsqrt.f32 %v963_v21  ;;  %vm970_vm10 = vweird.f32 %v963_v21 }
 0xa49   : > { %v1594_v22 = vpop.eup %1593 }
 0xa4a   : > { %v965_v23 = vmul.f32 %v1594_v22, %v963_v21  ;;  %vm971_vm9 = vweird.f32 %v1594_v22 }
 0xa4b   : > { %vm972_vm11 = vmor %vm970_vm10, %vm971_vm9 }
 0xa4c   : > { %v966_v24 = vmul.f32 %v1594_v22, %v965_v23 }
 0xa4e   : > { %v967_v25 = vmul.f32 0.5, %v966_v24 }
 0xa50   : > { %v968_v26 = vsub.f32 1.5, %v967_v25 }
 0xa52   : > { %v969_v27 = vmul.f32 %v1594_v22, %v968_v26 }
 0xa54   : > { %v973_v29 = vsel %vm972_vm11, %v1594_v22, %v969_v27 }
 0xa55   : > { %v974_v30 = vmul.f32 %v973_v29, %v947_v0  ;;  %v975_v31 = vmul.f32 %v973_v29, %v948_v2 }
 0xa57   : > { %v979_v33 = vmul.f32 %v1557_v28, %v974_v30  ;;  %v980_v34 = vmul.f32 %v1557_v28, %v975_v31 }
 0xa59   : > { %v986_v35 = vadd.f32 %v1558_v32, %v979_v33  ;;  %v987_v36 = vadd.f32 %v1558_v32, %v980_v34 }
 0xa5b   : > { %v988_v37 = vmax.f32 %v986_v35, 0.0  ;;  %v989_v38 = vmax.f32 %v987_v36, 0.0 }
 0xa5d   : > { %v990_v39 = vpack.c.bf16 %v989_v38, %v988_v37 }
 0xa5f   : > { %1435 = vmatmul.msk.bf16.vlgmr.msra.gmra.mxu0 %vm490_vm0, %v990_v39 }
 0xadc   : > { %v1025_v40 = vpop.f32.mrf.mxu0 }
 0xadd   : > { %v1026_v43 = vadd.f32 %v1559_v41, %v1025_v40 }
 0xae4   : > { %v1027_v42 = vpop.f32.mrf.mxu0 }
 0xae5   : > { %v1028_v44 = vadd.f32 %v1559_v41, %v1027_v42 }
 0xae7   : > { %v1030_v45 = vpack.c.bf16 %v1028_v44, %v1026_v43 }
 0xae9   : > { %1032 = vrot.lane.b32.xlu0 %v1030_v45, %s1839_s3 }
 0xb5b   : > { %v1033_v46 = vpop.permute.xlu0 %1032 }
 0xb5c   : > { %v1038_v47 = vsel %vm490_vm0, %v1033_v46, 0  ;;  %v1190_v46 = vld [vmem:[%s2199_s7 + $0x8] sm:$0xff] }
 0xb5d   : > { %1047 = vmatpush.bf16.xpose.msra.mxu1 %v1038_v47 }
 0xb64   : > { %1436 = vmatmul.msk.bf16.vlgmr.msra.gmra.mxu1 %vm490_vm0, %v1030_v45 }
 0xbe1   : > { %v1049_v48 = vpop.f32.mrf.mxu1 }
 0xbe2   : > { %v1050_v49 = vadd.f32 %v1049_v48, %v2044_v13 }
 0xbe4   : > { %v1054_v50 = vsel %vm532_vm1, %v1050_v49, -inf }
 0xbe5   : > { %1055 = vmax.xlane.f32.xlu0 %v1054_v50 }
 0xbe9   : > { %v1051_v51 = vpop.f32.mrf.mxu1 }
 0xbea   : > { %v1052_v52 = vadd.f32 %v1051_v51, %v2051_v19 }
 0xbec   : > { %v1057_v53 = vsel %vm532_vm1, %v1052_v52, -inf }
 0xbed   : > { %1058 = vmax.xlane.f32.xlu1 %v1057_v53  ;;  %v1560_v53 = vld [vmem:[#allocation8 + $0x3] ss:$0 sm:$0xff] }
 0xc06   : > { %1081 = vrot.lane.b32.xlu1 %v1030_v45, %s1841_s25  ;;  %s1386_s25 = sshll.u32 %s2013_s28, 1 }
 0xc07   : > { %s446_s23 = scalar_lea.vmem [#allocation11], %s1386_s25  ;;  %s1775_s25 = scalar_lea.hbm %s2201_s9, 4 }
 0xc08   : > { %s1235_s3 = sshll.u32 %s446_s23, 4  ;;  %p1777_p9 = scmp.lt.s32.totalorder %s1775_s25, %s1771_s19  ;;  %s1236_s3 = int_to_ptr.vmem [resolvable:$true] %s1235_s3 }
 0xc0a   : > { %p1778_p10 = por %p1777_p9, %p1776_p2 }
 0xc0c   : > { %p1779_p12 = pnand %p1778_p10, %p1774_p11 }
 0xc58   : > { %v1056_v54 = vpop.xlane.xlu0 %1055 }
 0xc59   : > { %v1060_v55 = vsub.f32 %v1050_v49, %v1056_v54 }
 0xc5b   : > { %v1062_v56 = vmul.f32 1.442695, %v1060_v55 }
 0xc5d   : > { %1595 = vpow2.f32 %v1062_v56 }
 0xc60   : > { %v1059_v57 = vpop.xlane.xlu1 %1058 }
 0xc61   : > { %v1061_v58 = vsub.f32 %v1052_v52, %v1059_v57  ;;  %v1561_v57 = vld [vmem:[#allocation10 + $0x3] ss:$0 sm:$0xff] }
 0xc63   : > { %v1596_v59 = vpop.eup %1595  ;;  %v1064_v60 = vmul.f32 1.442695, %v1061_v58 }
 0xc64   : > { %v1066_v13 = vmul.f32 %v1596_v59, %v2041_v11 }
 0xc65   : > { %1597 = vpow2.f32 %v1064_v60 }
 0xc66   : > { %v1068_v61 = vsel %vm532_vm1, %v1066_v13, 0.0 }
 0xc67   : > { %1069 = vadd.xlane.f32.xlu2 %v1068_v61 }
 0xc6b   : > { %v1598_v19 = vpop.eup %1597 }
 0xc6c   : > { %v1067_v62 = vmul.f32 %v1598_v19, %v2046_v14 }
 0xc6e   : > { %v1071_v63 = vsel %vm532_vm1, %v1067_v62, 0.0 }
 0xc6f   : > { %1072 = vadd.xlane.f32.xlu0 %v1071_v63 }
 0xc78   : > { %v1082_v0 = vpop.permute.xlu1 %1081 }
 0xc79   : > { %1102 = vmatpush.bf16.msra.mxu3 %v1082_v0  ;;  %v1562_v0 = vld [vmem:[%s2200_s8] ss:$0 sm:$0xff] }
 0xc7f   : > { %1086 = vrot.lane.b32.xlu2 %v1026_v43, %s1840_s24  ;;  %v1192_v43 = vld [vmem:[%s2199_s7 + $0x18] sm:$0xff] }
 0xc80   : > { %1212 = vmatpush.msrb.mxu0 %v1192_v43 }
 0xc83   : > { %1088 = vrot.lane.b32.xlu0 %v1028_v44, %s1840_s24  ;;  %v1191_v44 = vld [vmem:[%s2199_s7 + $0x10] sm:$0xff]  ;;  %s455_s24 = scalar_lea.vmem %s2194_s2, %s1389_s18  ;;  %s1223_s18 = scalar_lea.sflag [#allocation4], %s2013_s28 }
 0xc84   : > { %1213 = vmatpush.msrb.mxu0 %v1191_v44 }
 0xc86   : > { %1214 = vmatpush.msrb.mxu0 %v1190_v46 }
 0xcda   : > { %v1070_v2 = vpop.xlane.xlu2 %1069 }
 0xcdb   : > { %v1074_v3 = vmax.f32 %v1070_v2, 1e-30 }
 0xcdd   : > { %1599 = vrcp.f32 %v1074_v3 }
 0xce2   : > { %v1073_v4 = vpop.xlane.xlu0 %1072  ;;  %v1087_v10 = vpop.permute.xlu2 %1086 }
 0xce3   : > { %v1075_v11 = vmax.f32 %v1073_v4, 1e-30  ;;  %v1600_v5 = vpop.eup %1599 }
 0xce4   : > { %v1078_v7 = vmul.f32 %v1600_v5, %v1066_v13 }
 0xce5   : > { %1601 = vrcp.f32 %v1075_v11 }
 0xceb   : > { %v1602_v6 = vpop.eup %1601 }
 0xcec   : > { %v1079_v8 = vmul.f32 %v1602_v6, %v1067_v62  ;;  %v1163_v62 = vld [vmem:[%s455_s24] sm:$0x3] }
 0xcee   : > { %v1080_v14 = vpack.c.bf16 %v1079_v8, %v1078_v7 }
 0xcf0   : > { %1437 = vmatmul.msk.bf16.vlgmr.msra.gmra.mxu3 %vm532_vm1, %v1080_v14 }
 0xcf5   : > { %v1089_v15 = vpop.permute.xlu0 %1088 }
 0xd73   : > { %v1104_v9 = vpop.f32.mrf.mxu3 }
 0xd74   : > { %v1105_v12 = vadd.f32 %v1104_v9, %v1087_v10 }
 0xd76   : > { %v1109_v18 = vsel %vm490_vm0, %v1105_v12, 0.0 }
 0xd7b   : > { %v1106_v16 = vpop.f32.mrf.mxu3 }
 0xd7c   : > { %v1107_v17 = vadd.f32 %v1106_v16, %v1089_v15 }
 0xd7e   : > { %v1110_v20 = vsel %vm490_vm0, %v1107_v17, 0.0 }
 0xd7f   : > { %v1111_v21 = vadd.f32 %v1110_v20, %v1109_v18 }
 0xd81   : > { %v1112_v22 = vrot.slane %v1111_v21, 4 }
 0xd83   : > { %v1113_v23 = vadd.f32 %v1112_v22, %v1111_v21 }
 0xd85   : > { %v1114_v24 = vrot.slane %v1113_v23, 2 }
 0xd87   : > { %v1115_v25 = vadd.f32 %v1114_v24, %v1113_v23 }
 0xd89   : > { %v1116_v26 = vrot.slane %v1115_v25, 1 }
 0xd8b   : > { %v1117_v27 = vadd.f32 %v1116_v26, %v1115_v25 }
 0xd8d   : > { %v1118_v28 = vmul.f32 %v1117_v27, %v2065_v1 }
 0xd8f   : > { %v1119_v29 = vsub.f32 %v1105_v12, %v1118_v28  ;;  %v1120_v30 = vsub.f32 %v1107_v17, %v1118_v28 }
 0xd91   : > { %v1121_v31 = vmul.f32 %v1119_v29, %v1119_v29  ;;  %v1122_v32 = vmul.f32 %v1120_v30, %v1120_v30 }
 0xd93   : > { %v1123_v33 = vsel %vm490_vm0, %v1121_v31, 0.0  ;;  %v1124_v34 = vsel %vm490_vm0, %v1122_v32, 0.0 }
 0xd94   : > { %v1125_v35 = vadd.f32 %v1124_v34, %v1123_v33 }
 0xd96   : > { %v1126_v36 = vrot.slane %v1125_v35, 4 }
 0xd98   : > { %v1127_v37 = vadd.f32 %v1126_v36, %v1125_v35 }
 0xd9a   : > { %v1128_v38 = vrot.slane %v1127_v37, 2 }
 0xd9c   : > { %v1129_v39 = vadd.f32 %v1128_v38, %v1127_v37 }
 0xd9e   : > { %v1130_v40 = vrot.slane %v1129_v39, 1 }
 0xda0   : > { %v1131_v41 = vadd.f32 %v1130_v40, %v1129_v39 }
 0xda2   : > { %v1132_v42 = vmul.f32 %v1131_v41, %v2065_v1  ;;  %v1189_v1 = vld [vmem:[%s2199_s7] sm:$0xff] }
 0xda3   : > { %1215 = vmatpush.msrb.mxu0 %v1189_v1 }
 0xda4   : > { %v1135_v45 = vadd.f32 1e-05, %v1132_v42 }
 0xda6   : > { %1603 = vrsqrt.f32 %v1135_v45  ;;  %vm1142_vm13 = vweird.f32 %v1135_v45 }
 0xdac   : > { %v1604_v47 = vpop.eup %1603 }
 0xdad   : > { %v1137_v48 = vmul.f32 %v1604_v47, %v1135_v45  ;;  %vm1143_vm12 = vweird.f32 %v1604_v47 }
 0xdae   : > { %vm1144_vm14 = vmor %vm1142_vm13, %vm1143_vm12 }
 0xdaf   : > { %v1138_v49 = vmul.f32 %v1604_v47, %v1137_v48 }
 0xdb1   : > { %v1139_v50 = vmul.f32 0.5, %v1138_v49 }
 0xdb3   : > { %v1140_v51 = vsub.f32 1.5, %v1139_v50 }
 0xdb5   : > { %v1141_v52 = vmul.f32 %v1604_v47, %v1140_v51 }
 0xdb7   : > { %v1145_v54 = vsel %vm1144_vm14, %v1604_v47, %v1141_v52 }
 0xdb8   : > { %v1146_v55 = vmul.f32 %v1145_v54, %v1119_v29  ;;  %v1147_v56 = vmul.f32 %v1145_v54, %v1120_v30 }
 0xdba   : > { %v1152_v58 = vmul.f32 %v1560_v53, %v1147_v56  ;;  %v1151_v59 = vmul.f32 %v1560_v53, %v1146_v55 }
 0xdbc   : > { %v1159_v60 = vadd.f32 %v1561_v57, %v1152_v58  ;;  %v1158_v13 = vadd.f32 %v1561_v57, %v1151_v59 }
 0xdbe   : > { %v1161_v61 = vmax.f32 %v1159_v60, 0.0  ;;  %v1160_v19 = vmax.f32 %v1158_v13, 0.0 }
 0xdc0   : > { %1183 = vmatpush.msrb.mxu2 %v1161_v61 }
 0xdc2   : > { %1184 = vmatpush.msrb.mxu2 %v1160_v19 }
 0xdc3   : > { %1438 = vmatmul.msk.f32.vlgmr.msrb.gmra.mxu2 %vm532_vm1, %v1163_v62 }
 0xe46   : > { %v1186_v63 = vpop.f32.mrf.mxu2 }
 0xe47   : > { %1439 = vmatmul.msk.f32.vlgmr.msrb.gmra.mxu0 %vm490_vm0, %v1186_v63 }
 0xec4   : > { %v1217_v2 = vpop.f32.mrf.mxu0 }
 0xec5   : > { %v1218_v3 = vadd.f32 %v1562_v0, %v1217_v2 }
 0xec7   : > { %1221 = vst.msk [vmem:[%s446_s23] sm:$0x3] %vm1220_vm15, %v1218_v3 }
 0xec8   : > { %1782 = shalt.err (!%p1779_p12)
}
 0xec9   : > { %1473 = dma.vmem_to_hbm [thread:$0]  (%p1980_p3), %s1236_s3, 32, %s1238_s20, %s1223_s18  }
 0xeca PF: > { %s1249_s28 = sand.u32 1, %s1817_s30   ;;  %p2218_p13 = scmp.ge.s32.totalorder %s1829_s12, 2 }
 0xecb   : > { %s1250_s27 = scalar_lea.sflag [#allocation4], %s1249_s28 }
 0xecc   : > { %p1493_p0 = pnand %p2218_p13, %p1928_p6 }
 0xece   : > { %p1494_p5 = pneg %p1493_p0 }
 0xed0   : > { %1812 = dma.done.wait (%p1494_p5), %s1250_s27, 32  }
 0xed1   : > { %1814 = vsyncadd (%p1494_p5), %s1250_s27, 4294967264  ;;  %p24_p7 = scmp.ge.s32.totalorder %s1970_s26, 4   ;;  %s2219_s30 = smov %s1821_s10 }
 0xed2   : > { %s2220_s10 = smov %s1825_s11  ;;  %s2221_s11 = smov %s1986_s21 }
 0xed3   : > { %s2222_s12 = smov %s1970_s26  ;;  %26 = sbr.rel (!%p24_p7) target bundleno = 11 (0xb), region = 135 }
 0xed8   :  { %1256 = vsyncpa [#allocation3], 1 }
 0xed9   :  { %1258 = vsyncpa [#allocation3 + $0x1], 1 }
 0xeda   :  { %1259 = vsyncpa [#allocation6], 1 }
 0xedb   :  { %1260 = vsyncpa [#allocation9], 1 }
 0xedc   :  { %1261 = vsyncpa [#allocation4], 1 }
 0xedd   :  { %1263 = vsyncpa [#allocation4 + $0x1], 1 }

</bundles_post_ra>
